<compile_context>
chip_gen: v7x
topology: tpu7x:2x2x1
jax: 0.10.0
libtpu: 0.0.40
codegen_flags: <defaults>
</compile_context>

<pallas_src>
import functools

import jax
import jax.numpy as jnp
from jax import lax
from jax.experimental import pallas as pl
from jax.experimental.pallas import tpu as pltpu


def _pick_batch_tile(batch, seq_len, target_rows=512):
    """Largest divisor of `batch` whose tile has ~target_rows (TB*S) matmul rows."""
    tb = max(1, min(batch, target_rows // max(seq_len, 1)))
    while batch % tb:
        tb -= 1
    return tb


# ----------------------------------------------------------------------------
# Pallas kernel: one full transformer encoder layer for a TB-sized batch tile.
# Grid iterates over batch tiles ("parallel"); weights are full-resident blocks.
# ----------------------------------------------------------------------------
def encoder_layer_kernel(
    x_ref, mask_ref,
    wq_ref, bq_ref, wk_ref, bk_ref, wv_ref, bv_ref, wo_ref, bo_ref,
    ln1g_ref, ln1b_ref,
    w1_ref, b1_ref, w2_ref, b2_ref,
    ln2g_ref, ln2b_ref,
    out_ref,
    *, n_heads: int,
):
    cdt = jnp.bfloat16                     # MXU input dtype (f32 accumulation)
    x = x_ref[...]                         # (TB, S, D) float32
    TB, S, D = x.shape
    Dh = D // n_heads
    scale = 1.0 / jnp.sqrt(jnp.float32(Dh))
    eps = 1e-5

    x_flat = x.reshape(TB * S, D)          # (TB*S, D) — big MXU M dimension
    x_bf = x_flat.astype(cdt)

    # --- fused Q/K/V projections (bf16 MXU, f32 accumulate) ---------------------
    q = jnp.dot(x_bf, wq_ref[...], preferred_element_type=jnp.float32) + bq_ref[...]
    q = q * scale                          # fold 1/sqrt(Dh) into q once
    k = jnp.dot(x_bf, wk_ref[...], preferred_element_type=jnp.float32) + bk_ref[...]
    v = jnp.dot(x_bf, wv_ref[...], preferred_element_type=jnp.float32) + bv_ref[...]
    q3 = q.reshape(TB, S, D).astype(cdt)
    k3 = k.reshape(TB, S, D).astype(cdt)
    v3 = v.reshape(TB, S, D).astype(cdt)

    # --- key-padding mask as an additive bias, computed/broadcast ONCE ----------
    bias = jnp.where(mask_ref[...] > 0.0, 0.0, jnp.float32(-1e10))   # (TB, 1, S)
    bias = jnp.broadcast_to(bias, (TB, S, S))

    # --- attention: batched over the TB tile, single fused output projection ----
    # TODO(synk): fully head-batched (TB*H) scores need a 4-D transpose /
    #             multi-batch-dim dot_general that Mosaic does not lower
    #             reliably; heads stay a static (small) unrolled loop.
    ctx_heads = []
    for h in range(n_heads):
        lo = h * Dh
        qh = q3[:, :, lo:lo + Dh]
        kh = k3[:, :, lo:lo + Dh]
        vh = v3[:, :, lo:lo + Dh]
        e = jnp.einsum("bqd,bkd->bqk", qh, kh,
                       preferred_element_type=jnp.float32) + bias      # (TB, S, S)
        e = e - jnp.max(e, axis=-1, keepdims=True)
        p = jnp.exp(e)
        p = p * pl.reciprocal(jnp.sum(p, axis=-1, keepdims=True), approx=True)
        ctx_heads.append(jnp.einsum("bqk,bkd->bqd", p.astype(cdt), vh,
                                    preferred_element_type=jnp.float32))
    ctx = jnp.concatenate(ctx_heads, axis=-1).reshape(TB * S, D)
    attn = jnp.dot(ctx.astype(cdt), wo_ref[...],
                   preferred_element_type=jnp.float32) + bo_ref[...]

    # --- residual + LayerNorm 1 (f32 stats, rsqrt on EUP) ------------------------
    y = x_flat + attn
    mu = jnp.mean(y, axis=-1, keepdims=True)
    var = jnp.mean((y - mu) * (y - mu), axis=-1, keepdims=True)
    y = (y - mu) * lax.rsqrt(var + eps) * ln1g_ref[...] + ln1b_ref[...]

    # --- position-wise feed-forward ----------------------------------------------
    h1 = jnp.dot(y.astype(cdt), w1_ref[...],
                 preferred_element_type=jnp.float32) + b1_ref[...]
    h1 = jnp.maximum(h1, 0.0)
    f = jnp.dot(h1.astype(cdt), w2_ref[...],
                preferred_element_type=jnp.float32) + b2_ref[...]

    # --- residual + LayerNorm 2 ---------------------------------------------------
    z = y + f
    mu2 = jnp.mean(z, axis=-1, keepdims=True)
    var2 = jnp.mean((z - mu2) * (z - mu2), axis=-1, keepdims=True)
    z = (z - mu2) * lax.rsqrt(var2 + eps) * ln2g_ref[...] + ln2b_ref[...]

    out_ref[...] = z.reshape(TB, S, D)


def encoder_layer(x, mask, p, n_heads, tb):
    B, S, D = x.shape

    def full(arr):
        n = arr.ndim
        return pl.BlockSpec(arr.shape, lambda b, _n=n: (0,) * _n)

    in_specs = [
        pl.BlockSpec((tb, S, D), lambda b: (b, 0, 0)),     # x
        pl.BlockSpec((tb, 1, S), lambda b: (b, 0, 0)),     # key mask
        full(p["wq"]), full(p["bq"]),
        full(p["wk"]), full(p["bk"]),
        full(p["wv"]), full(p["bv"]),
        full(p["wo"]), full(p["bo"]),
        full(p["ln1_g"]), full(p["ln1_b"]),
        full(p["w1"]), full(p["b1"]),
        full(p["w2"]), full(p["b2"]),
        full(p["ln2_g"]), full(p["ln2_b"]),
    ]
    return pl.pallas_call(
        functools.partial(encoder_layer_kernel, n_heads=n_heads),
        out_shape=jax.ShapeDtypeStruct((B, S, D), jnp.float32),
        grid=(B // tb,),
        in_specs=in_specs,
        out_specs=pl.BlockSpec((tb, S, D), lambda b: (b, 0, 0)),
        compiler_params=pltpu.CompilerParams(dimension_semantics=("parallel",)),
    )(
        x, mask,
        p["wq"], p["bq"], p["wk"], p["bk"], p["wv"], p["bv"], p["wo"], p["bo"],
        p["ln1_g"], p["ln1_b"], p["w1"], p["b1"], p["w2"], p["b2"],
        p["ln2_g"], p["ln2_b"],
    )


# ----------------------------------------------------------------------------
# Pallas kernel: classifier head — max over sequence then linear projection.
# Tiled over the batch so large (B, S, D) inputs never need one VMEM block.
# ----------------------------------------------------------------------------
def classifier_kernel(x_ref, wc_ref, bc_ref, out_ref):
    x = x_ref[...]                                  # (TB, S, D)
    pooled = jnp.max(x, axis=1)                     # (TB, D)  (== x.max(dim=1)[0])
    out_ref[...] = (
        jnp.dot(pooled, wc_ref[...], preferred_element_type=jnp.float32) + bc_ref[...]
    )


def classifier_head(x, wc, bc, tb):
    B, S, D = x.shape
    C = wc.shape[1]
    return pl.pallas_call(
        classifier_kernel,
        out_shape=jax.ShapeDtypeStruct((B, C), jnp.float32),
        grid=(B // tb,),
        in_specs=[
            pl.BlockSpec((tb, S, D), lambda b: (b, 0, 0)),
            pl.BlockSpec((D, C), lambda b: (0, 0)),
            pl.BlockSpec((1, C), lambda b: (0, 0)),
        ],
        out_specs=pl.BlockSpec((tb, C), lambda b: (b, 0)),
        compiler_params=pltpu.CompilerParams(dimension_semantics=("parallel",)),
    )(x, wc, bc)


# ----------------------------------------------------------------------------
# Full forward pass (embedding gather is plain-JAX glue, everything else Pallas).
# ----------------------------------------------------------------------------
def encoder_classifier_forward(tokens, params, *, n_heads, pad_idx, batch_tile=None):
    B, S = tokens.shape
    D = params["tok_emb"].shape[1]
    emb_scale = jnp.sqrt(jnp.float32(D))
    pos = jnp.arange(S)
    x = (params["tok_emb"][tokens] * emb_scale
         + params["pos_emb"][pos][None, :, :]).astype(jnp.float32)
    mask = (tokens != pad_idx).astype(jnp.float32).reshape(B, 1, S)
    tb = batch_tile or _pick_batch_tile(B, S)
    for lp in params["layers"]:
        x = encoder_layer(x, mask, lp, n_heads, tb)
    return classifier_head(x, params["wc"], params["bc"], tb)


# ----------------------------------------------------------------------------
# Deterministic parameter construction.  MatMul weights in bf16, rest f32.
# ----------------------------------------------------------------------------
def init_params(key, *, vocab_size, n_layers, n_classes, embed_dim, ff_hid_dim,
                max_length):
    def nrm(k, shape, s=0.02, dtype=jnp.float32):
        return (s * jax.random.normal(k, shape)).astype(dtype)

    keys = iter(jax.random.split(key, 8 + 12 * n_layers))
    params = {
        "tok_emb": nrm(next(keys), (vocab_size, embed_dim), 1.0),
        "pos_emb": nrm(next(keys), (max_length, embed_dim), 1.0),
        "wc": nrm(next(keys), (embed_dim, n_classes)),
        "bc": jnp.zeros((1, n_classes), jnp.float32),
        "layers": [],
    }
    for _ in range(n_layers):
        lp = {
            "wq": nrm(next(keys), (embed_dim, embed_dim), dtype=jnp.bfloat16),
            "bq": jnp.zeros((1, embed_dim), jnp.float32),
            "wk": nrm(next(keys), (embed_dim, embed_dim), dtype=jnp.bfloat16),
            "bk": jnp.zeros((1, embed_dim), jnp.float32),
            "wv": nrm(next(keys), (embed_dim, embed_dim), dtype=jnp.bfloat16),
            "bv": jnp.zeros((1, embed_dim), jnp.float32),
            "wo": nrm(next(keys), (embed_dim, embed_dim), dtype=jnp.bfloat16),
            "bo": jnp.zeros((1, embed_dim), jnp.float32),
            "ln1_g": jnp.ones((1, embed_dim), jnp.float32),
            "ln1_b": jnp.zeros((1, embed_dim), jnp.float32),
            "w1": nrm(next(keys), (embed_dim, ff_hid_dim), dtype=jnp.bfloat16),
            "b1": jnp.zeros((1, ff_hid_dim), jnp.float32),
            "w2": nrm(next(keys), (ff_hid_dim, embed_dim), dtype=jnp.bfloat16),
            "b2": jnp.zeros((1, embed_dim), jnp.float32),
            "ln2_g": jnp.ones((1, embed_dim), jnp.float32),
            "ln2_b": jnp.zeros((1, embed_dim), jnp.float32),
        }
        params["layers"].append(lp)
    return params


if __name__ == "__main__":
    # Small config consistent with the module's constructor.
    vocab_size = 50
    n_layers = 2
    n_classes = 3
    embed_dim = 32
    n_heads = 4
    ff_hid_dim = 64
    max_length = 16
    pad_idx = 0

    B, S = 2, 8

    root = jax.random.PRNGKey(0)
    k_tok, k_par = jax.random.split(root)

    tokens = jax.random.randint(k_tok, (B, S), 1, vocab_size, dtype=jnp.int32)
    tokens = tokens.at[:, 6:].set(pad_idx)   # trailing padding, exercises the mask

    params = init_params(
        k_par,
        vocab_size=vocab_size, n_layers=n_layers, n_classes=n_classes,
        embed_dim=embed_dim, ff_hid_dim=ff_hid_dim, max_length=max_length,
    )

    logits = encoder_classifier_forward(tokens, params, n_heads=n_heads, pad_idx=pad_idx)
    logits = jax.block_until_ready(logits)
    assert logits.shape == (B, n_classes) and logits.dtype == jnp.float32
    print("KERNEL_OK")
</pallas_src>

<mosaic_0001>
module attributes {stable_mosaic.version = 11 : i64} {
  func.func @encoder_layer_kernel(%arg0: i32, %arg1: memref<2x8x32xf32, #tpu.memory_space<vmem>>, %arg2: memref<2x1x8xf32, #tpu.memory_space<vmem>>, %arg3: memref<32x32xbf16, #tpu.memory_space<vmem>>, %arg4: memref<1x32xf32, #tpu.memory_space<vmem>>, %arg5: memref<32x32xbf16, #tpu.memory_space<vmem>>, %arg6: memref<1x32xf32, #tpu.memory_space<vmem>>, %arg7: memref<32x32xbf16, #tpu.memory_space<vmem>>, %arg8: memref<1x32xf32, #tpu.memory_space<vmem>>, %arg9: memref<32x32xbf16, #tpu.memory_space<vmem>>, %arg10: memref<1x32xf32, #tpu.memory_space<vmem>>, %arg11: memref<1x32xf32, #tpu.memory_space<vmem>>, %arg12: memref<1x32xf32, #tpu.memory_space<vmem>>, %arg13: memref<32x64xbf16, #tpu.memory_space<vmem>>, %arg14: memref<1x64xf32, #tpu.memory_space<vmem>>, %arg15: memref<64x32xbf16, #tpu.memory_space<vmem>>, %arg16: memref<1x32xf32, #tpu.memory_space<vmem>>, %arg17: memref<1x32xf32, #tpu.memory_space<vmem>>, %arg18: memref<1x32xf32, #tpu.memory_space<vmem>>, %arg19: memref<2x8x32xf32, #tpu.memory_space<vmem>>) attributes {dimension_semantics = [#tpu.dimension_semantics<parallel>], iteration_bounds = array<i64: 1>, scalar_prefetch = 0 : i64, scratch_operands = 0 : i64, tpu.core_type = #tpu.core_type<tc>, window_params = [{transform_indices = @transform_0, window_bounds = array<i64: 2, 8, 32>}, {transform_indices = @transform_1, window_bounds = array<i64: 2, 1, 8>}, {pipeline_mode = #tpu.pipeline_mode<synchronous>, transform_indices = @transform_2, window_bounds = array<i64: 32, 32>}, {pipeline_mode = #tpu.pipeline_mode<synchronous>, transform_indices = @transform_3, window_bounds = array<i64: 1, 32>}, {pipeline_mode = #tpu.pipeline_mode<synchronous>, transform_indices = @transform_4, window_bounds = array<i64: 32, 32>}, {pipeline_mode = #tpu.pipeline_mode<synchronous>, transform_indices = @transform_5, window_bounds = array<i64: 1, 32>}, {pipeline_mode = #tpu.pipeline_mode<synchronous>, transform_indices = @transform_6, window_bounds = array<i64: 32, 32>}, {pipeline_mode = #tpu.pipeline_mode<synchronous>, transform_indices = @transform_7, window_bounds = array<i64: 1, 32>}, {pipeline_mode = #tpu.pipeline_mode<synchronous>, transform_indices = @transform_8, window_bounds = array<i64: 32, 32>}, {pipeline_mode = #tpu.pipeline_mode<synchronous>, transform_indices = @transform_9, window_bounds = array<i64: 1, 32>}, {pipeline_mode = #tpu.pipeline_mode<synchronous>, transform_indices = @transform_10, window_bounds = array<i64: 1, 32>}, {pipeline_mode = #tpu.pipeline_mode<synchronous>, transform_indices = @transform_11, window_bounds = array<i64: 1, 32>}, {pipeline_mode = #tpu.pipeline_mode<synchronous>, transform_indices = @transform_12, window_bounds = array<i64: 32, 64>}, {pipeline_mode = #tpu.pipeline_mode<synchronous>, transform_indices = @transform_13, window_bounds = array<i64: 1, 64>}, {pipeline_mode = #tpu.pipeline_mode<synchronous>, transform_indices = @transform_14, window_bounds = array<i64: 64, 32>}, {pipeline_mode = #tpu.pipeline_mode<synchronous>, transform_indices = @transform_15, window_bounds = array<i64: 1, 32>}, {pipeline_mode = #tpu.pipeline_mode<synchronous>, transform_indices = @transform_16, window_bounds = array<i64: 1, 32>}, {pipeline_mode = #tpu.pipeline_mode<synchronous>, transform_indices = @transform_17, window_bounds = array<i64: 1, 32>}, {transform_indices = @transform_18, window_bounds = array<i64: 2, 8, 32>}]} {
    %c0 = arith.constant 0 : index
    %c0_0 = arith.constant 0 : index
    %c0_1 = arith.constant 0 : index
    %0 = vector.load %arg1[%c0, %c0_0, %c0_1] : memref<2x8x32xf32, #tpu.memory_space<vmem>>, vector<2x8x32xf32>
    %cst = arith.constant 8.000000e+00 : f32
    %1 = math.sqrt %cst : f32
    %cst_2 = arith.constant 1.000000e+00 : f32
    %2 = arith.divf %cst_2, %1 : f32
    %3 = vector.shape_cast %0 : vector<2x8x32xf32> to vector<16x32xf32>
    %4 = arith.truncf %3 : vector<16x32xf32> to vector<16x32xbf16>
    %c0_3 = arith.constant 0 : index
    %c0_4 = arith.constant 0 : index
    %5 = vector.load %arg3[%c0_3, %c0_4] : memref<32x32xbf16, #tpu.memory_space<vmem>>, vector<32x32xbf16>
    %cst_5 = arith.constant dense<0.000000e+00> : vector<16x32xf32>
    %6 = tpu.matmul %4, %5, %cst_5 {dimension_numbers = #tpu.dot_dimension_numbers<[1], [0], [0], [1], [0, 0, 1, 1], [], []>} : vector<16x32xbf16>, vector<32x32xbf16>, vector<16x32xf32> -> vector<16x32xf32>
    %c0_6 = arith.constant 0 : index
    %c0_7 = arith.constant 0 : index
    %7 = vector.load %arg4[%c0_6, %c0_7] : memref<1x32xf32, #tpu.memory_space<vmem>>, vector<1x32xf32>
    %8 = vector.broadcast %7 : vector<1x32xf32> to vector<16x32xf32>
    %9 = arith.addf %6, %8 : vector<16x32xf32>
    %10 = vector.broadcast %2 : f32 to vector<16x32xf32>
    %11 = arith.mulf %9, %10 : vector<16x32xf32>
    %c0_8 = arith.constant 0 : index
    %c0_9 = arith.constant 0 : index
    %12 = vector.load %arg5[%c0_8, %c0_9] : memref<32x32xbf16, #tpu.memory_space<vmem>>, vector<32x32xbf16>
    %cst_10 = arith.constant dense<0.000000e+00> : vector<16x32xf32>
    %13 = tpu.matmul %4, %12, %cst_10 {dimension_numbers = #tpu.dot_dimension_numbers<[1], [0], [0], [1], [0, 0, 1, 1], [], []>} : vector<16x32xbf16>, vector<32x32xbf16>, vector<16x32xf32> -> vector<16x32xf32>
    %c0_11 = arith.constant 0 : index
    %c0_12 = arith.constant 0 : index
    %14 = vector.load %arg6[%c0_11, %c0_12] : memref<1x32xf32, #tpu.memory_space<vmem>>, vector<1x32xf32>
    %15 = vector.broadcast %14 : vector<1x32xf32> to vector<16x32xf32>
    %16 = arith.addf %13, %15 : vector<16x32xf32>
    %c0_13 = arith.constant 0 : index
    %c0_14 = arith.constant 0 : index
    %17 = vector.load %arg7[%c0_13, %c0_14] : memref<32x32xbf16, #tpu.memory_space<vmem>>, vector<32x32xbf16>
    %cst_15 = arith.constant dense<0.000000e+00> : vector<16x32xf32>
    %18 = tpu.matmul %4, %17, %cst_15 {dimension_numbers = #tpu.dot_dimension_numbers<[1], [0], [0], [1], [0, 0, 1, 1], [], []>} : vector<16x32xbf16>, vector<32x32xbf16>, vector<16x32xf32> -> vector<16x32xf32>
    %c0_16 = arith.constant 0 : index
    %c0_17 = arith.constant 0 : index
    %19 = vector.load %arg8[%c0_16, %c0_17] : memref<1x32xf32, #tpu.memory_space<vmem>>, vector<1x32xf32>
    %20 = vector.broadcast %19 : vector<1x32xf32> to vector<16x32xf32>
    %21 = arith.addf %18, %20 : vector<16x32xf32>
    %22 = vector.shape_cast %11 : vector<16x32xf32> to vector<2x8x32xf32>
    %23 = arith.truncf %22 : vector<2x8x32xf32> to vector<2x8x32xbf16>
    %24 = vector.shape_cast %16 : vector<16x32xf32> to vector<2x8x32xf32>
    %25 = arith.truncf %24 : vector<2x8x32xf32> to vector<2x8x32xbf16>
    %26 = vector.shape_cast %21 : vector<16x32xf32> to vector<2x8x32xf32>
    %27 = arith.truncf %26 : vector<2x8x32xf32> to vector<2x8x32xbf16>
    %c0_18 = arith.constant 0 : index
    %c0_19 = arith.constant 0 : index
    %c0_20 = arith.constant 0 : index
    %28 = vector.load %arg2[%c0_18, %c0_19, %c0_20] : memref<2x1x8xf32, #tpu.memory_space<vmem>>, vector<2x1x8xf32>
    %cst_21 = arith.constant 0.000000e+00 : f32
    %29 = vector.broadcast %cst_21 : f32 to vector<2x1x8xf32>
    %30 = arith.cmpf ogt, %28, %29 : vector<2x1x8xf32>
    %cst_22 = arith.constant 0.000000e+00 : f32
    %cst_23 = arith.constant -1.000000e+10 : f32
    %31 = vector.broadcast %cst_22 : f32 to vector<2x1x8xf32>
    %32 = vector.broadcast %cst_23 : f32 to vector<2x1x8xf32>
    %33 = arith.select %30, %31, %32 : vector<2x1x8xi1>, vector<2x1x8xf32>
    %34 = vector.shape_cast %33 : vector<2x1x8xf32> to vector<2x1x8xf32>
    %35 = vector.broadcast %34 : vector<2x1x8xf32> to vector<2x8x8xf32>
    %36 = vector.extract_strided_slice %23 {offsets = [0, 0, 0], sizes = [2, 8, 8], strides = [1, 1, 1]} : vector<2x8x32xbf16> to vector<2x8x8xbf16>
    %37 = vector.extract_strided_slice %25 {offsets = [0, 0, 0], sizes = [2, 8, 8], strides = [1, 1, 1]} : vector<2x8x32xbf16> to vector<2x8x8xbf16>
    %38 = vector.extract_strided_slice %27 {offsets = [0, 0, 0], sizes = [2, 8, 8], strides = [1, 1, 1]} : vector<2x8x32xbf16> to vector<2x8x8xbf16>
    "tpu.trace_start"() <{level = 10 : i32, message = "bqd,bkd->bqk"}> : () -> ()
    %cst_24 = arith.constant dense<0.000000e+00> : vector<2x8x8xf32>
    %39 = tpu.matmul %36, %37, %cst_24 {dimension_numbers = #tpu.dot_dimension_numbers<[2], [2], [1], [1], [0, 0, 0, 1, 1, 1], [0], [0]>} : vector<2x8x8xbf16>, vector<2x8x8xbf16>, vector<2x8x8xf32> -> vector<2x8x8xf32>
    "tpu.trace_stop"() : () -> ()
    %40 = arith.addf %39, %35 : vector<2x8x8xf32>
    %cst_25 = arith.constant dense<0xFF800000> : vector<2x8xf32>
    %41 = vector.multi_reduction <maximumf>, %40, %cst_25 [2] : vector<2x8x8xf32> to vector<2x8xf32>
    %42 = vector.shape_cast %41 : vector<2x8xf32> to vector<2x8x1xf32>
    %43 = vector.broadcast %42 : vector<2x8x1xf32> to vector<2x8x8xf32>
    %44 = arith.subf %40, %43 : vector<2x8x8xf32>
    %45 = math.exp %44 : vector<2x8x8xf32>
    %cst_26 = arith.constant dense<0.000000e+00> : vector<2x8xf32>
    %46 = vector.multi_reduction <add>, %45, %cst_26 [2] : vector<2x8x8xf32> to vector<2x8xf32>
    %47 = vector.shape_cast %46 : vector<2x8xf32> to vector<2x8x1xf32>
    %48 = tpu.reciprocal %47 {approx = true} : vector<2x8x1xf32> -> vector<2x8x1xf32>
    %49 = vector.broadcast %48 : vector<2x8x1xf32> to vector<2x8x8xf32>
    %50 = arith.mulf %45, %49 : vector<2x8x8xf32>
    %51 = arith.truncf %50 : vector<2x8x8xf32> to vector<2x8x8xbf16>
    "tpu.trace_start"() <{level = 10 : i32, message = "bqk,bkd->bqd"}> : () -> ()
    %cst_27 = arith.constant dense<0.000000e+00> : vector<2x8x8xf32>
    %52 = tpu.matmul %51, %38, %cst_27 {dimension_numbers = #tpu.dot_dimension_numbers<[2], [1], [1], [2], [0, 0, 0, 1, 1, 2], [0], [0]>} : vector<2x8x8xbf16>, vector<2x8x8xbf16>, vector<2x8x8xf32> -> vector<2x8x8xf32>
    "tpu.trace_stop"() : () -> ()
    %53 = vector.extract_strided_slice %23 {offsets = [0, 0, 8], sizes = [2, 8, 8], strides = [1, 1, 1]} : vector<2x8x32xbf16> to vector<2x8x8xbf16>
    %54 = vector.extract_strided_slice %25 {offsets = [0, 0, 8], sizes = [2, 8, 8], strides = [1, 1, 1]} : vector<2x8x32xbf16> to vector<2x8x8xbf16>
    %55 = vector.extract_strided_slice %27 {offsets = [0, 0, 8], sizes = [2, 8, 8], strides = [1, 1, 1]} : vector<2x8x32xbf16> to vector<2x8x8xbf16>
    "tpu.trace_start"() <{level = 10 : i32, message = "bqd,bkd->bqk"}> : () -> ()
    %cst_28 = arith.constant dense<0.000000e+00> : vector<2x8x8xf32>
    %56 = tpu.matmul %53, %54, %cst_28 {dimension_numbers = #tpu.dot_dimension_numbers<[2], [2], [1], [1], [0, 0, 0, 1, 1, 1], [0], [0]>} : vector<2x8x8xbf16>, vector<2x8x8xbf16>, vector<2x8x8xf32> -> vector<2x8x8xf32>
    "tpu.trace_stop"() : () -> ()
    %57 = arith.addf %56, %35 : vector<2x8x8xf32>
    %cst_29 = arith.constant dense<0xFF800000> : vector<2x8xf32>
    %58 = vector.multi_reduction <maximumf>, %57, %cst_29 [2] : vector<2x8x8xf32> to vector<2x8xf32>
    %59 = vector.shape_cast %58 : vector<2x8xf32> to vector<2x8x1xf32>
    %60 = vector.broadcast %59 : vector<2x8x1xf32> to vector<2x8x8xf32>
    %61 = arith.subf %57, %60 : vector<2x8x8xf32>
    %62 = math.exp %61 : vector<2x8x8xf32>
    %cst_30 = arith.constant dense<0.000000e+00> : vector<2x8xf32>
    %63 = vector.multi_reduction <add>, %62, %cst_30 [2] : vector<2x8x8xf32> to vector<2x8xf32>
    %64 = vector.shape_cast %63 : vector<2x8xf32> to vector<2x8x1xf32>
    %65 = tpu.reciprocal %64 {approx = true} : vector<2x8x1xf32> -> vector<2x8x1xf32>
    %66 = vector.broadcast %65 : vector<2x8x1xf32> to vector<2x8x8xf32>
    %67 = arith.mulf %62, %66 : vector<2x8x8xf32>
    %68 = arith.truncf %67 : vector<2x8x8xf32> to vector<2x8x8xbf16>
    "tpu.trace_start"() <{level = 10 : i32, message = "bqk,bkd->bqd"}> : () -> ()
    %cst_31 = arith.constant dense<0.000000e+00> : vector<2x8x8xf32>
    %69 = tpu.matmul %68, %55, %cst_31 {dimension_numbers = #tpu.dot_dimension_numbers<[2], [1], [1], [2], [0, 0, 0, 1, 1, 2], [0], [0]>} : vector<2x8x8xbf16>, vector<2x8x8xbf16>, vector<2x8x8xf32> -> vector<2x8x8xf32>
    "tpu.trace_stop"() : () -> ()
    %70 = vector.extract_strided_slice %23 {offsets = [0, 0, 16], sizes = [2, 8, 8], strides = [1, 1, 1]} : vector<2x8x32xbf16> to vector<2x8x8xbf16>
    %71 = vector.extract_strided_slice %25 {offsets = [0, 0, 16], sizes = [2, 8, 8], strides = [1, 1, 1]} : vector<2x8x32xbf16> to vector<2x8x8xbf16>
    %72 = vector.extract_strided_slice %27 {offsets = [0, 0, 16], sizes = [2, 8, 8], strides = [1, 1, 1]} : vector<2x8x32xbf16> to vector<2x8x8xbf16>
    "tpu.trace_start"() <{level = 10 : i32, message = "bqd,bkd->bqk"}> : () -> ()
    %cst_32 = arith.constant dense<0.000000e+00> : vector<2x8x8xf32>
    %73 = tpu.matmul %70, %71, %cst_32 {dimension_numbers = #tpu.dot_dimension_numbers<[2], [2], [1], [1], [0, 0, 0, 1, 1, 1], [0], [0]>} : vector<2x8x8xbf16>, vector<2x8x8xbf16>, vector<2x8x8xf32> -> vector<2x8x8xf32>
    "tpu.trace_stop"() : () -> ()
    %74 = arith.addf %73, %35 : vector<2x8x8xf32>
    %cst_33 = arith.constant dense<0xFF800000> : vector<2x8xf32>
    %75 = vector.multi_reduction <maximumf>, %74, %cst_33 [2] : vector<2x8x8xf32> to vector<2x8xf32>
    %76 = vector.shape_cast %75 : vector<2x8xf32> to vector<2x8x1xf32>
    %77 = vector.broadcast %76 : vector<2x8x1xf32> to vector<2x8x8xf32>
    %78 = arith.subf %74, %77 : vector<2x8x8xf32>
    %79 = math.exp %78 : vector<2x8x8xf32>
    %cst_34 = arith.constant dense<0.000000e+00> : vector<2x8xf32>
    %80 = vector.multi_reduction <add>, %79, %cst_34 [2] : vector<2x8x8xf32> to vector<2x8xf32>
    %81 = vector.shape_cast %80 : vector<2x8xf32> to vector<2x8x1xf32>
    %82 = tpu.reciprocal %81 {approx = true} : vector<2x8x1xf32> -> vector<2x8x1xf32>
    %83 = vector.broadcast %82 : vector<2x8x1xf32> to vector<2x8x8xf32>
    %84 = arith.mulf %79, %83 : vector<2x8x8xf32>
    %85 = arith.truncf %84 : vector<2x8x8xf32> to vector<2x8x8xbf16>
    "tpu.trace_start"() <{level = 10 : i32, message = "bqk,bkd->bqd"}> : () -> ()
    %cst_35 = arith.constant dense<0.000000e+00> : vector<2x8x8xf32>
    %86 = tpu.matmul %85, %72, %cst_35 {dimension_numbers = #tpu.dot_dimension_numbers<[2], [1], [1], [2], [0, 0, 0, 1, 1, 2], [0], [0]>} : vector<2x8x8xbf16>, vector<2x8x8xbf16>, vector<2x8x8xf32> -> vector<2x8x8xf32>
    "tpu.trace_stop"() : () -> ()
    %87 = vector.extract_strided_slice %23 {offsets = [0, 0, 24], sizes = [2, 8, 8], strides = [1, 1, 1]} : vector<2x8x32xbf16> to vector<2x8x8xbf16>
    %88 = vector.extract_strided_slice %25 {offsets = [0, 0, 24], sizes = [2, 8, 8], strides = [1, 1, 1]} : vector<2x8x32xbf16> to vector<2x8x8xbf16>
    %89 = vector.extract_strided_slice %27 {offsets = [0, 0, 24], sizes = [2, 8, 8], strides = [1, 1, 1]} : vector<2x8x32xbf16> to vector<2x8x8xbf16>
    "tpu.trace_start"() <{level = 10 : i32, message = "bqd,bkd->bqk"}> : () -> ()
    %cst_36 = arith.constant dense<0.000000e+00> : vector<2x8x8xf32>
    %90 = tpu.matmul %87, %88, %cst_36 {dimension_numbers = #tpu.dot_dimension_numbers<[2], [2], [1], [1], [0, 0, 0, 1, 1, 1], [0], [0]>} : vector<2x8x8xbf16>, vector<2x8x8xbf16>, vector<2x8x8xf32> -> vector<2x8x8xf32>
    "tpu.trace_stop"() : () -> ()
    %91 = arith.addf %90, %35 : vector<2x8x8xf32>
    %cst_37 = arith.constant dense<0xFF800000> : vector<2x8xf32>
    %92 = vector.multi_reduction <maximumf>, %91, %cst_37 [2] : vector<2x8x8xf32> to vector<2x8xf32>
    %93 = vector.shape_cast %92 : vector<2x8xf32> to vector<2x8x1xf32>
    %94 = vector.broadcast %93 : vector<2x8x1xf32> to vector<2x8x8xf32>
    %95 = arith.subf %91, %94 : vector<2x8x8xf32>
    %96 = math.exp %95 : vector<2x8x8xf32>
    %cst_38 = arith.constant dense<0.000000e+00> : vector<2x8xf32>
    %97 = vector.multi_reduction <add>, %96, %cst_38 [2] : vector<2x8x8xf32> to vector<2x8xf32>
    %98 = vector.shape_cast %97 : vector<2x8xf32> to vector<2x8x1xf32>
    %99 = tpu.reciprocal %98 {approx = true} : vector<2x8x1xf32> -> vector<2x8x1xf32>
    %100 = vector.broadcast %99 : vector<2x8x1xf32> to vector<2x8x8xf32>
    %101 = arith.mulf %96, %100 : vector<2x8x8xf32>
    %102 = arith.truncf %101 : vector<2x8x8xf32> to vector<2x8x8xbf16>
    "tpu.trace_start"() <{level = 10 : i32, message = "bqk,bkd->bqd"}> : () -> ()
    %cst_39 = arith.constant dense<0.000000e+00> : vector<2x8x8xf32>
    %103 = tpu.matmul %102, %89, %cst_39 {dimension_numbers = #tpu.dot_dimension_numbers<[2], [1], [1], [2], [0, 0, 0, 1, 1, 2], [0], [0]>} : vector<2x8x8xbf16>, vector<2x8x8xbf16>, vector<2x8x8xf32> -> vector<2x8x8xf32>
    "tpu.trace_stop"() : () -> ()
    %104 = tpu.concatenate %52, %69, %86, %103 in 2 : vector<2x8x8xf32>, vector<2x8x8xf32>, vector<2x8x8xf32>, vector<2x8x8xf32> -> vector<2x8x32xf32>
    %105 = vector.shape_cast %104 : vector<2x8x32xf32> to vector<16x32xf32>
    %106 = arith.truncf %105 : vector<16x32xf32> to vector<16x32xbf16>
    %c0_40 = arith.constant 0 : index
    %c0_41 = arith.constant 0 : index
    %107 = vector.load %arg9[%c0_40, %c0_41] : memref<32x32xbf16, #tpu.memory_space<vmem>>, vector<32x32xbf16>
    %cst_42 = arith.constant dense<0.000000e+00> : vector<16x32xf32>
    %108 = tpu.matmul %106, %107, %cst_42 {dimension_numbers = #tpu.dot_dimension_numbers<[1], [0], [0], [1], [0, 0, 1, 1], [], []>} : vector<16x32xbf16>, vector<32x32xbf16>, vector<16x32xf32> -> vector<16x32xf32>
    %c0_43 = arith.constant 0 : index
    %c0_44 = arith.constant 0 : index
    %109 = vector.load %arg10[%c0_43, %c0_44] : memref<1x32xf32, #tpu.memory_space<vmem>>, vector<1x32xf32>
    %110 = vector.broadcast %109 : vector<1x32xf32> to vector<16x32xf32>
    %111 = arith.addf %108, %110 : vector<16x32xf32>
    %112 = arith.addf %3, %111 : vector<16x32xf32>
    %cst_45 = arith.constant dense<0.000000e+00> : vector<16xf32>
    %113 = vector.multi_reduction <add>, %112, %cst_45 [1] : vector<16x32xf32> to vector<16xf32>
    %114 = vector.shape_cast %113 : vector<16xf32> to vector<16x1xf32>
    %cst_46 = arith.constant 3.200000e+01 : f32
    %115 = vector.broadcast %cst_46 : f32 to vector<16x1xf32>
    %116 = arith.divf %114, %115 : vector<16x1xf32>
    %117 = vector.broadcast %116 : vector<16x1xf32> to vector<16x32xf32>
    %118 = arith.subf %112, %117 : vector<16x32xf32>
    %119 = vector.broadcast %116 : vector<16x1xf32> to vector<16x32xf32>
    %120 = arith.subf %112, %119 : vector<16x32xf32>
    %121 = arith.mulf %118, %120 : vector<16x32xf32>
    %cst_47 = arith.constant dense<0.000000e+00> : vector<16xf32>
    %122 = vector.multi_reduction <add>, %121, %cst_47 [1] : vector<16x32xf32> to vector<16xf32>
    %123 = vector.shape_cast %122 : vector<16xf32> to vector<16x1xf32>
    %cst_48 = arith.constant 3.200000e+01 : f32
    %124 = vector.broadcast %cst_48 : f32 to vector<16x1xf32>
    %125 = arith.divf %123, %124 : vector<16x1xf32>
    %126 = vector.broadcast %116 : vector<16x1xf32> to vector<16x32xf32>
    %127 = arith.subf %112, %126 : vector<16x32xf32>
    %cst_49 = arith.constant 9.99999974E-6 : f32
    %128 = vector.broadcast %cst_49 : f32 to vector<16x1xf32>
    %129 = arith.addf %125, %128 : vector<16x1xf32>
    %130 = math.rsqrt %129 : vector<16x1xf32>
    %131 = vector.broadcast %130 : vector<16x1xf32> to vector<16x32xf32>
    %132 = arith.mulf %127, %131 : vector<16x32xf32>
    %c0_50 = arith.constant 0 : index
    %c0_51 = arith.constant 0 : index
    %133 = vector.load %arg11[%c0_50, %c0_51] : memref<1x32xf32, #tpu.memory_space<vmem>>, vector<1x32xf32>
    %134 = vector.broadcast %133 : vector<1x32xf32> to vector<16x32xf32>
    %135 = arith.mulf %132, %134 : vector<16x32xf32>
    %c0_52 = arith.constant 0 : index
    %c0_53 = arith.constant 0 : index
    %136 = vector.load %arg12[%c0_52, %c0_53] : memref<1x32xf32, #tpu.memory_space<vmem>>, vector<1x32xf32>
    %137 = vector.broadcast %136 : vector<1x32xf32> to vector<16x32xf32>
    %138 = arith.addf %135, %137 : vector<16x32xf32>
    %139 = arith.truncf %138 : vector<16x32xf32> to vector<16x32xbf16>
    %c0_54 = arith.constant 0 : index
    %c0_55 = arith.constant 0 : index
    %140 = vector.load %arg13[%c0_54, %c0_55] : memref<32x64xbf16, #tpu.memory_space<vmem>>, vector<32x64xbf16>
    %cst_56 = arith.constant dense<0.000000e+00> : vector<16x64xf32>
    %141 = tpu.matmul %139, %140, %cst_56 {dimension_numbers = #tpu.dot_dimension_numbers<[1], [0], [0], [1], [0, 0, 1, 1], [], []>} : vector<16x32xbf16>, vector<32x64xbf16>, vector<16x64xf32> -> vector<16x64xf32>
    %c0_57 = arith.constant 0 : index
    %c0_58 = arith.constant 0 : index
    %142 = vector.load %arg14[%c0_57, %c0_58] : memref<1x64xf32, #tpu.memory_space<vmem>>, vector<1x64xf32>
    %143 = vector.broadcast %142 : vector<1x64xf32> to vector<16x64xf32>
    %144 = arith.addf %141, %143 : vector<16x64xf32>
    %cst_59 = arith.constant 0.000000e+00 : f32
    %145 = vector.broadcast %cst_59 : f32 to vector<16x64xf32>
    %146 = arith.maximumf %144, %145 : vector<16x64xf32>
    %147 = arith.truncf %146 : vector<16x64xf32> to vector<16x64xbf16>
    %c0_60 = arith.constant 0 : index
    %c0_61 = arith.constant 0 : index
    %148 = vector.load %arg15[%c0_60, %c0_61] : memref<64x32xbf16, #tpu.memory_space<vmem>>, vector<64x32xbf16>
    %cst_62 = arith.constant dense<0.000000e+00> : vector<16x32xf32>
    %149 = tpu.matmul %147, %148, %cst_62 {dimension_numbers = #tpu.dot_dimension_numbers<[1], [0], [0], [1], [0, 0, 1, 1], [], []>} : vector<16x64xbf16>, vector<64x32xbf16>, vector<16x32xf32> -> vector<16x32xf32>
    %c0_63 = arith.constant 0 : index
    %c0_64 = arith.constant 0 : index
    %150 = vector.load %arg16[%c0_63, %c0_64] : memref<1x32xf32, #tpu.memory_space<vmem>>, vector<1x32xf32>
    %151 = vector.broadcast %150 : vector<1x32xf32> to vector<16x32xf32>
    %152 = arith.addf %149, %151 : vector<16x32xf32>
    %153 = arith.addf %138, %152 : vector<16x32xf32>
    %cst_65 = arith.constant dense<0.000000e+00> : vector<16xf32>
    %154 = vector.multi_reduction <add>, %153, %cst_65 [1] : vector<16x32xf32> to vector<16xf32>
    %155 = vector.shape_cast %154 : vector<16xf32> to vector<16x1xf32>
    %cst_66 = arith.constant 3.200000e+01 : f32
    %156 = vector.broadcast %cst_66 : f32 to vector<16x1xf32>
    %157 = arith.divf %155, %156 : vector<16x1xf32>
    %158 = vector.broadcast %157 : vector<16x1xf32> to vector<16x32xf32>
    %159 = arith.subf %153, %158 : vector<16x32xf32>
    %160 = vector.broadcast %157 : vector<16x1xf32> to vector<16x32xf32>
    %161 = arith.subf %153, %160 : vector<16x32xf32>
    %162 = arith.mulf %159, %161 : vector<16x32xf32>
    %cst_67 = arith.constant dense<0.000000e+00> : vector<16xf32>
    %163 = vector.multi_reduction <add>, %162, %cst_67 [1] : vector<16x32xf32> to vector<16xf32>
    %164 = vector.shape_cast %163 : vector<16xf32> to vector<16x1xf32>
    %cst_68 = arith.constant 3.200000e+01 : f32
    %165 = vector.broadcast %cst_68 : f32 to vector<16x1xf32>
    %166 = arith.divf %164, %165 : vector<16x1xf32>
    %167 = vector.broadcast %157 : vector<16x1xf32> to vector<16x32xf32>
    %168 = arith.subf %153, %167 : vector<16x32xf32>
    %cst_69 = arith.constant 9.99999974E-6 : f32
    %169 = vector.broadcast %cst_69 : f32 to vector<16x1xf32>
    %170 = arith.addf %166, %169 : vector<16x1xf32>
    %171 = math.rsqrt %170 : vector<16x1xf32>
    %172 = vector.broadcast %171 : vector<16x1xf32> to vector<16x32xf32>
    %173 = arith.mulf %168, %172 : vector<16x32xf32>
    %c0_70 = arith.constant 0 : index
    %c0_71 = arith.constant 0 : index
    %174 = vector.load %arg17[%c0_70, %c0_71] : memref<1x32xf32, #tpu.memory_space<vmem>>, vector<1x32xf32>
    %175 = vector.broadcast %174 : vector<1x32xf32> to vector<16x32xf32>
    %176 = arith.mulf %173, %175 : vector<16x32xf32>
    %c0_72 = arith.constant 0 : index
    %c0_73 = arith.constant 0 : index
    %177 = vector.load %arg18[%c0_72, %c0_73] : memref<1x32xf32, #tpu.memory_space<vmem>>, vector<1x32xf32>
    %178 = vector.broadcast %177 : vector<1x32xf32> to vector<16x32xf32>
    %179 = arith.addf %176, %178 : vector<16x32xf32>
    %180 = vector.shape_cast %179 : vector<16x32xf32> to vector<2x8x32xf32>
    %c0_74 = arith.constant 0 : index
    %c0_75 = arith.constant 0 : index
    %c0_76 = arith.constant 0 : index
    %181 = vector.load %arg19[%c0_74, %c0_75, %c0_76] : memref<2x8x32xf32, #tpu.memory_space<vmem>>, vector<2x8x32xf32>
    tpu.vector_store %arg19[%c0_74, %c0_75, %c0_76], %180 {strides = array<i32>} : memref<2x8x32xf32, #tpu.memory_space<vmem>>, vector<2x8x32xf32>,
    return
  }
  func.func @transform_0(%arg0: i32) -> (i32, i32, i32) {
    %c0_i32 = arith.constant 0 : i32
    %c0_i32_0 = arith.constant 0 : i32
    %c0_i32_1 = arith.constant 0 : i32
    return %arg0, %c0_i32, %c0_i32_0 : i32, i32, i32
  }
  func.func @transform_1(%arg0: i32) -> (i32, i32, i32) {
    %c0_i32 = arith.constant 0 : i32
    %c0_i32_0 = arith.constant 0 : i32
    %c0_i32_1 = arith.constant 0 : i32
    return %arg0, %c0_i32, %c0_i32_0 : i32, i32, i32
  }
  func.func @transform_2(%arg0: i32) -> (i32, i32) {
    %c0_i32 = arith.constant 0 : i32
    %c0_i32_0 = arith.constant 0 : i32
    %c0_i32_1 = arith.constant 0 : i32
    return %c0_i32, %c0_i32_0 : i32, i32
  }
  func.func @transform_3(%arg0: i32) -> (i32, i32) {
    %c0_i32 = arith.constant 0 : i32
    %c0_i32_0 = arith.constant 0 : i32
    %c0_i32_1 = arith.constant 0 : i32
    return %c0_i32, %c0_i32_0 : i32, i32
  }
  func.func @transform_4(%arg0: i32) -> (i32, i32) {
    %c0_i32 = arith.constant 0 : i32
    %c0_i32_0 = arith.constant 0 : i32
    %c0_i32_1 = arith.constant 0 : i32
    return %c0_i32, %c0_i32_0 : i32, i32
  }
  func.func @transform_5(%arg0: i32) -> (i32, i32) {
    %c0_i32 = arith.constant 0 : i32
    %c0_i32_0 = arith.constant 0 : i32
    %c0_i32_1 = arith.constant 0 : i32
    return %c0_i32, %c0_i32_0 : i32, i32
  }
  func.func @transform_6(%arg0: i32) -> (i32, i32) {
    %c0_i32 = arith.constant 0 : i32
    %c0_i32_0 = arith.constant 0 : i32
    %c0_i32_1 = arith.constant 0 : i32
    return %c0_i32, %c0_i32_0 : i32, i32
  }
  func.func @transform_7(%arg0: i32) -> (i32, i32) {
    %c0_i32 = arith.constant 0 : i32
    %c0_i32_0 = arith.constant 0 : i32
    %c0_i32_1 = arith.constant 0 : i32
    return %c0_i32, %c0_i32_0 : i32, i32
  }
  func.func @transform_8(%arg0: i32) -> (i32, i32) {
    %c0_i32 = arith.constant 0 : i32
    %c0_i32_0 = arith.constant 0 : i32
    %c0_i32_1 = arith.constant 0 : i32
    return %c0_i32, %c0_i32_0 : i32, i32
  }
  func.func @transform_9(%arg0: i32) -> (i32, i32) {
    %c0_i32 = arith.constant 0 : i32
    %c0_i32_0 = arith.constant 0 : i32
    %c0_i32_1 = arith.constant 0 : i32
    return %c0_i32, %c0_i32_0 : i32, i32
  }
  func.func @transform_10(%arg0: i32) -> (i32, i32) {
    %c0_i32 = arith.constant 0 : i32
    %c0_i32_0 = arith.constant 0 : i32
    %c0_i32_1 = arith.constant 0 : i32
    return %c0_i32, %c0_i32_0 : i32, i32
  }
  func.func @transform_11(%arg0: i32) -> (i32, i32) {
    %c0_i32 = arith.constant 0 : i32
    %c0_i32_0 = arith.constant 0 : i32
    %c0_i32_1 = arith.constant 0 : i32
    return %c0_i32, %c0_i32_0 : i32, i32
  }
  func.func @transform_12(%arg0: i32) -> (i32, i32) {
    %c0_i32 = arith.constant 0 : i32
    %c0_i32_0 = arith.constant 0 : i32
    %c0_i32_1 = arith.constant 0 : i32
    return %c0_i32, %c0_i32_0 : i32, i32
  }
  func.func @transform_13(%arg0: i32) -> (i32, i32) {
    %c0_i32 = arith.constant 0 : i32
    %c0_i32_0 = arith.constant 0 : i32
    %c0_i32_1 = arith.constant 0 : i32
    return %c0_i32, %c0_i32_0 : i32, i32
  }
  func.func @transform_14(%arg0: i32) -> (i32, i32) {
    %c0_i32 = arith.constant 0 : i32
    %c0_i32_0 = arith.constant 0 : i32
    %c0_i32_1 = arith.constant 0 : i32
    return %c0_i32, %c0_i32_0 : i32, i32
  }
  func.func @transform_15(%arg0: i32) -> (i32, i32) {
    %c0_i32 = arith.constant 0 : i32
    %c0_i32_0 = arith.constant 0 : i32
    %c0_i32_1 = arith.constant 0 : i32
    return %c0_i32, %c0_i32_0 : i32, i32
  }
  func.func @transform_16(%arg0: i32) -> (i32, i32) {
    %c0_i32 = arith.constant 0 : i32
    %c0_i32_0 = arith.constant 0 : i32
    %c0_i32_1 = arith.constant 0 : i32
    return %c0_i32, %c0_i32_0 : i32, i32
  }
  func.func @transform_17(%arg0: i32) -> (i32, i32) {
    %c0_i32 = arith.constant 0 : i32
    %c0_i32_0 = arith.constant 0 : i32
    %c0_i32_1 = arith.constant 0 : i32
    return %c0_i32, %c0_i32_0 : i32, i32
  }
  func.func @transform_18(%arg0: i32) -> (i32, i32, i32) {
    %c0_i32 = arith.constant 0 : i32
    %c0_i32_0 = arith.constant 0 : i32
    %c0_i32_1 = arith.constant 0 : i32
    return %arg0, %c0_i32, %c0_i32_0 : i32, i32, i32
  }
}

</mosaic_0001>

<bundles_post_ra>
// kernel: tpu_custom_call.1
= control target key start
LH: loop header
LB: loop body
LE: loop exit
PB: predicated region body
PF: predicated region fallthrough
CT: control target
= control target key end

     0   :  { %s2599_s0 = inlined_call_operand.vmem [shape: f32[2,8,32], index: 0, kind: input, shape index: {}]   ;;  %s2600_s1 = inlined_call_operand.vmem [shape: f32[2,1,8], index: 1, kind: input, shape index: {}]   ;;  %s2601_s2 = inlined_call_operand.vmem [shape: bf16[32,32], index: 2, kind: input, shape index: {}]   ;;  %s2602_s3 = inlined_call_operand.hbm [shape: f32[1,32], index: 3, kind: input, shape index: {}]   ;;  %s2603_s4 = inlined_call_operand.vmem [shape: bf16[32,32], index: 4, kind: input, shape index: {}]   ;;  %s2604_s5 = inlined_call_operand.hbm [shape: f32[1,32], index: 5, kind: input, shape index: {}]   ;;  %s2605_s6 = inlined_call_operand.hbm [shape: bf16[32,32], index: 6, kind: input, shape index: {}]   ;;  %s2606_s7 = inlined_call_operand.hbm [shape: f32[1,32], index: 7, kind: input, shape index: {}]   ;;  %s2607_s8 = inlined_call_operand.hbm [shape: bf16[32,32], index: 8, kind: input, shape index: {}]   ;;  %s2608_s9 = inlined_call_operand.hbm [shape: f32[1,32], index: 9, kind: input, shape index: {}]   ;;  %s2609_s10 = inlined_call_operand.vmem [shape: f32[1,32], index: 10, kind: input, shape index: {}]   ;;  %s2610_s11 = inlined_call_operand.vmem [shape: f32[1,32], index: 11, kind: input, shape index: {}]   ;;  %s2611_s12 = inlined_call_operand.vmem [shape: bf16[32,64], index: 12, kind: input, shape index: {}]   ;;  %s2612_s13 = inlined_call_operand.vmem [shape: f32[1,64], index: 13, kind: input, shape index: {}]   ;;  %s2613_s14 = inlined_call_operand.vmem [shape: bf16[64,32], index: 14, kind: input, shape index: {}]   ;;  %s2614_s15 = inlined_call_operand.vmem [shape: f32[1,32], index: 15, kind: input, shape index: {}]   ;;  %s2615_s16 = inlined_call_operand.vmem [shape: f32[1,32], index: 16, kind: input, shape index: {}]   ;;  %s2616_s17 = inlined_call_operand.vmem [shape: f32[1,32], index: 17, kind: input, shape index: {}]   ;;  %s2617_s18 = inlined_call_operand.hbm [shape: f32[2,8,32], index: 18, kind: output, shape index: {}]  }
   0x1   :  { %2621 = sst [smem:[#allocation19_spill]] %s2599_s0 }
   0x2   :  { %2622 = sst [smem:[#allocation20_spill]] %s2600_s1 }
   0x3   :  { %2623 = sst [smem:[#allocation21_spill]] %s2601_s2 }
   0x4   :  { %23 = vsyncpa [#allocation3], 0 }
   0x5   :  { %24 = vsyncpa [#allocation6], 0 }
   0x6   :  { %25 = vsyncpa [#allocation9], 0 }
   0x7   :  { %26 = vsyncpa [#allocation12], 0 }
   0x8   :  { %27 = vsyncpa [#allocation4], 0  ;;  %s2104_s27 = smov [#allocation5]   ;;  %s2105_s29 = smov [#allocation8]  }
   0x9   :  { %s52_s28 = sshll.u32 %s2104_s27, 4  ;;  %s74_s30 = sshll.u32 %s2105_s29, 4  ;;  %s53_s28 = int_to_ptr.vmem [resolvable:$true] %s52_s28  ;;  %s75_s30 = int_to_ptr.vmem [resolvable:$true] %s74_s30 }
   0xa   :  { %s1940_s1 = scalar_lea.hbm %s2604_s5, 16 }
   0xb   :  { %p1941_p0 = scmp.ne.s32.totalorder %s2604_s5, %s1940_s1  ;;  %p1944_p1 = scmp.lt.u32.totalorder %s1940_s1, %s2604_s5 }
   0xd   :  { %p1946_p2 = pnand %p1944_p1, %p1941_p0 }
   0xf   :  { %1949 = shalt.err (!%p1946_p2)
}
  0x10   :  { %s1950_s23 = scalar_lea.vmem %s53_s28, 16  ;;  %s1954_s24 = scalar_lea.vmem %s53_s28, 32 }
  0x11   :  { %p1951_p3 = scmp.ne.s32.totalorder %s53_s28, %s1950_s23  ;;  %p1955_p4 = scmp.lt.s32.totalorder %s53_s28, %s53_s28 }
  0x12   :  { %p1956_p5 = scmp.lt.s32.totalorder %s1954_s24, %s1950_s23 }
  0x14   :  { %p1957_p6 = por %p1956_p5, %p1955_p4 }
  0x16   :  { %p1958_p7 = pnand %p1957_p6, %p1951_p3 }
  0x18   :  { %1961 = shalt.err (!%p1958_p7)
}
  0x19   :  { %55 = dma.hbm_to_vmem [thread:$0]  %s2604_s5, 16, %s53_s28, [#allocation6]  }
  0x1a   :  { %s1962_s0 = scalar_lea.hbm %s2606_s7, 16 }
  0x1b   :  { %p1963_p8 = scmp.ne.s32.totalorder %s2606_s7, %s1962_s0  ;;  %p1966_p9 = scmp.lt.u32.totalorder %s1962_s0, %s2606_s7 }
  0x1d   :  { %p1968_p10 = pnand %p1966_p9, %p1963_p8 }
  0x1f   :  { %1971 = shalt.err (!%p1968_p10)
}
  0x20   :  { %s1972_s22 = scalar_lea.vmem %s75_s30, 16  ;;  %s1976_s2 = scalar_lea.vmem %s75_s30, 32 }
  0x21   :  { %p1973_p11 = scmp.ne.s32.totalorder %s75_s30, %s1972_s22  ;;  %p1977_p12 = scmp.lt.s32.totalorder %s75_s30, %s75_s30 }
  0x22   :  { %p1978_p13 = scmp.lt.s32.totalorder %s1976_s2, %s1972_s22 }
  0x24   :  { %p1979_p0 = por %p1978_p13, %p1977_p12 }
  0x26   :  { %p1980_p1 = pnand %p1979_p0, %p1973_p11 }
  0x28   :  { %1983 = shalt.err (!%p1980_p1)
}
  0x29   :  { %77 = dma.hbm_to_vmem [thread:$0]  %s2606_s7, 16, %s75_s30, [#allocation9]  }
  0x2a   :  { %s2106_s23 = smov [#allocation2]   ;;  %s2107_s25 = smov [#allocation7]  }
  0x2b   :  { %s40_s24 = sshll.u32 %s2106_s23, 4  ;;  %s61_s26 = sshll.u32 %s2107_s25, 4  ;;  %s41_s24 = int_to_ptr.vmem [resolvable:$true] %s40_s24  ;;  %s2242_s26 = int_to_ptr.vmem [resolvable:$true] %s61_s26 }
  0x2c   :  { %s1984_s0 = scalar_lea.hbm %s2602_s3, 16 }
  0x2d   :  { %p1985_p2 = scmp.ne.s32.totalorder %s2602_s3, %s1984_s0  ;;  %p1988_p3 = scmp.lt.u32.totalorder %s1984_s0, %s2602_s3 }
  0x2f   :  { %p1990_p4 = pnand %p1988_p3, %p1985_p2 }
  0x31   :  { %1993 = shalt.err (!%p1990_p4)
}
  0x32   :  { %s1994_s7 = scalar_lea.vmem %s41_s24, 16  ;;  %s1998_s30 = scalar_lea.vmem %s41_s24, 32 }
  0x33   :  { %p1995_p5 = scmp.ne.s32.totalorder %s41_s24, %s1994_s7  ;;  %p1999_p6 = scmp.lt.s32.totalorder %s41_s24, %s41_s24 }
  0x34   :  { %p2000_p7 = scmp.lt.s32.totalorder %s1998_s30, %s1994_s7 }
  0x36   :  { %p2001_p8 = por %p2000_p7, %p1999_p6 }
  0x38   :  { %p2002_p9 = pnand %p2001_p8, %p1995_p5 }
  0x3a   :  { %2005 = shalt.err (!%p2002_p9)
}
  0x3b   :  { %43 = dma.hbm_to_vmem [thread:$0]  %s2602_s3, 16, %s41_s24, [#allocation3]  }
  0x3c   :  { %s2006_s23 = scalar_lea.hbm %s2605_s6, 256 }
  0x3d   :  { %p2007_p10 = scmp.ne.s32.totalorder %s2605_s6, %s2006_s23  ;;  %p2010_p11 = scmp.lt.u32.totalorder %s2006_s23, %s2605_s6 }
  0x3f   :  { %p2012_p12 = pnand %p2010_p11, %p2007_p10 }
  0x41   :  { %2015 = shalt.err (!%p2012_p12)
}
  0x42   :  { %s2016_s19 = scalar_lea.vmem %s2242_s26, 256  ;;  %p2021_p0 = scmp.lt.s32.totalorder %s2242_s26, %s2242_s26 }
  0x43   :  { %p2017_p13 = scmp.ne.s32.totalorder %s2242_s26, %s2016_s19  ;;  %p2022_p1 = scmp.lt.s32.totalorder %s2016_s19, %s2016_s19 }
  0x45   :  { %p2023_p2 = por %p2022_p1, %p2021_p0 }
  0x47   :  { %p2024_p3 = pnand %p2023_p2, %p2017_p13 }
  0x49   :  { %2027 = shalt.err (!%p2024_p3)
}
  0x4a   :  { %s2108_s3 = smov 64   ;;  %s2109_s24 = smov 4  }
  0x4b   :  { %67 = dma.hbm_to_vmem [thread:$0]  %s2605_s6, 256, %s2242_s26, [#allocation6], %s2108_s3, %s2108_s3, %s2109_s24  }
  0x4c   :  { %s2110_s21 = smov [#allocation10]   ;;  %s2111_s30 = smov [#allocation11]  }
  0x4d   :  { %s83_s7 = sshll.u32 %s2110_s21, 4  ;;  %s96_s22 = sshll.u32 %s2111_s30, 4  ;;  %s84_s7 = int_to_ptr.vmem [resolvable:$true] %s83_s7  ;;  %s97_s22 = int_to_ptr.vmem [resolvable:$true] %s96_s22 }
  0x4e   :  { %s2028_s28 = scalar_lea.hbm %s2607_s8, 256 }
  0x4f   :  { %p2029_p4 = scmp.ne.s32.totalorder %s2607_s8, %s2028_s28  ;;  %p2032_p5 = scmp.lt.u32.totalorder %s2028_s28, %s2607_s8 }
  0x51   :  { %p2034_p6 = pnand %p2032_p5, %p2029_p4 }
  0x53   :  { %2037 = shalt.err (!%p2034_p6)
}
  0x54   :  { %s2038_s6 = scalar_lea.vmem %s84_s7, 256  ;;  %p2043_p8 = scmp.lt.s32.totalorder %s84_s7, %s84_s7 }
  0x55   :  { %p2039_p7 = scmp.ne.s32.totalorder %s84_s7, %s2038_s6  ;;  %p2044_p9 = scmp.lt.s32.totalorder %s2038_s6, %s2038_s6 }
  0x57   :  { %p2045_p10 = por %p2044_p9, %p2043_p8 }
  0x59   :  { %p2046_p11 = pnand %p2045_p10, %p2039_p7 }
  0x5b   :  { %2049 = shalt.err (!%p2046_p11)
}
  0x5c   :  { %89 = dma.hbm_to_vmem [thread:$0]  %s2607_s8, 256, %s84_s7, [#allocation9], %s2108_s3, %s2108_s3, %s2109_s24  }
  0x5d   :  { %s2050_s20 = scalar_lea.hbm %s2608_s9, 16 }
  0x5e   :  { %p2051_p12 = scmp.ne.s32.totalorder %s2608_s9, %s2050_s20  ;;  %p2054_p13 = scmp.lt.u32.totalorder %s2050_s20, %s2608_s9 }
  0x60   :  { %p2056_p0 = pnand %p2054_p13, %p2051_p12 }
  0x62   :  { %2059 = shalt.err (!%p2056_p0)
}
  0x63   :  { %s2060_s28 = scalar_lea.vmem %s97_s22, 16  ;;  %s2064_s23 = scalar_lea.vmem %s97_s22, 32 }
  0x64   :  { %p2061_p1 = scmp.ne.s32.totalorder %s97_s22, %s2060_s28  ;;  %p2065_p2 = scmp.lt.s32.totalorder %s97_s22, %s97_s22 }
  0x65   :  { %p2066_p3 = scmp.lt.s32.totalorder %s2064_s23, %s2060_s28 }
  0x67   :  { %p2067_p4 = por %p2066_p3, %p2065_p2 }
  0x69   :  { %p2068_p5 = pnand %p2067_p4, %p2061_p1 }
  0x6b   :  { %2071 = shalt.err (!%p2068_p5)
}
  0x6c   :  { %99 = dma.hbm_to_vmem [thread:$0]  %s2608_s9, 16, %s97_s22, [#allocation12]  }
  0x6d   :  { %2094 = dma.done.wait [#allocation3], 16  }
  0x6e   :  { %2095 = vsyncadd [#allocation3], 4294967280 }
  0x6f   :  { %2096 = dma.done.wait [#allocation6], 272  }
  0x70   :  { %2097 = vsyncadd [#allocation6], 4294967024 }
  0x71   :  { %2098 = dma.done.wait [#allocation9], 272  }
  0x72   :  { %2099 = vsyncadd [#allocation9], 4294967024 }
  0x73   :  { %2100 = dma.done.wait [#allocation12], 16  }
  0x74   :  { %2101 = vsyncadd [#allocation12], 4294967280  ;;  %v2112_v0 = vmov 0.0   ;;  %vm2113_vm0 = vmmov 0   ;;  %v1886_v1 = vld [vmem:[%s2603_s4] sm:$0xff]   ;;  %s2624_s25 = sld [smem:[#allocation21_spill]]  ;;  %v350_v43 = vlaneseq }
  0x75   :  { %1712 = vmatprep.subr.bf16.mxu1 %v2112_v0  ;;  %1704 = vmatprep.subr.bf16.mxu0 %v2112_v0  ;;  %v1888_v3 = vld [vmem:[%s2603_s4 + $0x8] sm:$0xff]   ;;  %s2625_s1 = sld [smem:[#allocation19_spill]]  ;;  %vm161_vm1 = vcmask 261120   ;;  %v1610_v10 = vld [vmem:[#allocation5] ss:$0 sm:$0xff]  ;;  %vm360_vm2 = vcmask 64512  }
  0x76   :  { %1716 = vmatprep.mubr.msk.bf16.mxu1 %vm2113_vm0, %v2112_v0  ;;  %1708 = vmatprep.mubr.msk.bf16.mxu0 %vm2113_vm0, %v2112_v0  ;;  %v1890_v8 = vld [vmem:[#allocation7] sm:$0xff]   ;;  %v1891_v9 = vld [vmem:[#allocation7 + $0x8] sm:$0xff]   ;;  %v1606_v11 = vld [vmem:[#allocation2] ss:$0 sm:$0xff]  ;;  %s2114_s4 = smov 120   ;;  %vm480_vm3 = vcmask 1043456  }
  0x77   :  { %1713 = vmatpush3.bf16.msra.mxu1 %v1886_v1  ;;  %v1614_v36 = vld [vmem:[#allocation8] ss:$0 sm:$0xff]  ;;  %s2626_s5 = sld [smem:[#allocation20_spill]]  ;;  %v351_v45 = vshrl.u32 %v350_v43, 7  ;;  %v2115_v48 = vmov -1e+10  }
  0x78   :  { %1714 = vmatprep.subr.bf16.mxu1 %v2112_v0  ;;  %s2116_s8 = smov 112   ;;  %s2117_s3 = smov 104   ;;  %vm1262_vm6 = vcmask 130048   ;;  %vm1265_vm7 = vcmask 195584   ;;  %vm1493_vm8 = vcmask 523264  }
  0x79   :  { %v352_v47 = vsub.s32 0, %v351_v45  ;;  %s2118_s9 = smov 8   ;;  %s2119_s24 = smov 16  }
  0x7a   :  { %v1887_v2 = vld [vmem:[%s2624_s25] sm:$0xff]   ;;  %v1889_v4 = vld [vmem:[%s2624_s25 + $0x8] sm:$0xff]   ;;  %s2120_s7 = smov 24  }
  0x7b   :  { %1705 = vmatpush3.bf16.msra.mxu0 %v1887_v2  ;;  %v2320_v5 = vld [vmem:[%s2625_s1] sm:$0xff]  ;;  %v2325_v6 = vld [vmem:[%s2625_s1 + $0x8] sm:$0xff]  ;;  %1715 = vmatpush3.bf16.msra.mxu1 %v1888_v3 }
  0x7c   :  { %1706 = vmatprep.subr.bf16.mxu0 %v2112_v0  ;;  %v137_v7 = vpack.c.bf16 %v2325_v6, %v2320_v5  ;;  %1728 = vmatprep.subr.bf16.mxu1 %v2112_v0 }
  0x7d   :  { %v342_v44 = vld [vmem:[%s2626_s5] sm:$0x1]  ;;  %v343_v46 = vld [vmem:[%s2626_s5 + $0x1] sm:$0x1] }
  0x7e   :  { %1717 = vmatmul.mubr.msk.bf16.vlgmr.msra.gmra.mrb[0].mxu1 %vm161_vm1, %v137_v7  ;;  %vm344_vm4 = vcmp.gt.f32.partialorder %v342_v44, 0.0  ;;  %vm345_vm5 = vcmp.gt.f32.partialorder %v343_v46, 0.0 }
  0x7f   :  { %1707 = vmatpush3.bf16.msra.mxu0 %v1889_v4  ;;  %1730 = vmatprep.mubr.msk.bf16.mxu1 %vm2113_vm0, %v2112_v0  ;;  %v346_v49 = vsel %vm344_vm4, 0.0, %v2115_v48  ;;  %v347_v50 = vsel %vm345_vm5, 0.0, %v2115_v48 }
  0x80   :  { %1720 = vmatprep.subr.bf16.mxu0 %v2112_v0  ;;  %v2382_v51 = vrot.slane %v346_v49, %v352_v47  ;;  %v2384_v52 = vrot.slane %v347_v50, %v352_v47 }
  0x82   :  { %1709 = vmatmul.mubr.msk.bf16.vlgmr.msra.gmra.mrb[0].mxu0 %vm161_vm1, %v137_v7 }
  0x83   :  { %1721 = vmatpush3.bf16.msra.mxu0 %v1890_v8  ;;  %1724 = vmatprep.mubr.msk.bf16.mxu0 %vm2113_vm0, %v2112_v0 }
  0x84   :  { %1722 = vmatprep.subr.bf16.mxu0 %v2112_v0 }
  0x87   :  { %1723 = vmatpush3.bf16.msra.mxu0 %v1891_v9 }
  0x88   :  { %1734 = vmatprep.subr.bf16.mxu0 %v2112_v0 }
  0x8a   :  { %1725 = vmatmul.mubr.msk.bf16.vlgmr.msra.gmra.mrb[4].mxu0 %vm161_vm1, %v137_v7 }
  0x8b   :  { %1736 = vmatprep.mubr.msk.bf16.mxu0 %vm2113_vm0, %v2112_v0 }
 0x151   :  { %v265_v12 = vpop.f32.mrb[0].mxu1 }
 0x152   :  { %v266_v13 = vadd.f32 %v1610_v10, %v265_v12  ;;  %v1718_v14 = vpop.f32.mrb[1].mxu1 }
 0x153   :  { %v268_v16 = vpop.f32.mrb[2].mxu1 }
 0x154   :  { %v2342_v19 = vpack.c.bf16 %v266_v13, %v266_v13  ;;  %v269_v20 = vadd.f32 %v1610_v10, %v268_v16  ;;  %v1719_v21 = vpop.f32.mrb[3].mxu1 }
 0x155   :  { %v199_v15 = vpop.f32.mrb[0].mxu0 }
 0x156   :  { %v200_v17 = vadd.f32 %v1606_v11, %v199_v15  ;;  %v1710_v18 = vpop.f32.mrb[1].mxu0  ;;  %v2344_v24 = vpack.c.bf16 %v269_v20, %v269_v20  ;;  %v365_v27 = vsel %vm360_vm2, %v2342_v19, 0 }
 0x157   :  { %v202_v22 = vpop.f32.mrb[2].mxu0  ;;  %1729 = vmatpush3.bf16.xpose.msra.mxu1 %v365_v27 }
 0x158   :  { %v1711_v23 = vpop.f32.mrb[3].mxu0  ;;  %v206_v25 = vmul.f32 0.35355338, %v200_v17  ;;  %v203_v26 = vadd.f32 %v1606_v11, %v202_v22  ;;  %626 = vrot.lane.b32.xlu1 %v2344_v24, %s2114_s4  ;;  %v411_v28 = vsel %vm360_vm2, %v2344_v24, 0  ;;  %1740 = vmatprep.subr.bf16.mxu1 %v2112_v0 }
 0x159   :  { %1735 = vmatpush3.bf16.xpose.msra.mxu0 %v411_v28 }
 0x15a   :  { %v2353_v29 = vpack.c.bf16 %v206_v25, %v206_v25  ;;  %v207_v30 = vmul.f32 0.35355338, %v203_v26  ;;  %1746 = vmatprep.subr.bf16.mxu0 %v2112_v0 }
 0x15c   :  { %v2356_v35 = vpack.c.bf16 %v207_v30, %v207_v30 }
 0x15d   :  { %v329_v31 = vpop.f32.mrb[4].mxu0 }
 0x15e   :  { %v1726_v32 = vpop.f32.mrb[5].mxu0  ;;  %1731 = vmatmul.mubr.msk.bf16.vlgmr.msra.gmra.mrb[4].mxu1 %vm360_vm2, %v2353_v29  ;;  %v330_v37 = vadd.f32 %v1614_v36, %v329_v31 }
 0x15f   :  { %v332_v33 = vpop.f32.mrb[6].mxu0  ;;  %1742 = vmatprep.mubr.msk.bf16.mxu1 %vm2113_vm0, %v2112_v0 }
 0x160   :  { %v1727_v34 = vpop.f32.mrb[7].mxu0  ;;  %1737 = vmatmul.mubr.msk.bf16.vlgmr.msra.gmra.mrb[8].mxu0 %vm360_vm2, %v2356_v35  ;;  %v333_v38 = vadd.f32 %v1614_v36, %v332_v33  ;;  %v2366_v39 = vpack.c.bf16 %v330_v37, %v330_v37 }
 0x161   :  { %1748 = vmatprep.mubr.msk.bf16.mxu0 %vm2113_vm0, %v2112_v0 }
 0x162   :  { %v2368_v40 = vpack.c.bf16 %v333_v38, %v333_v38  ;;  %v482_v41 = vsel %vm480_vm3, %v2366_v39, 0 }
 0x163   :  { %1741 = vmatpush3.bf16.msra.mxu1 %v482_v41 }
 0x164   :  { %v528_v42 = vsel %vm480_vm3, %v2368_v40, 0  ;;  %1752 = vmatprep.subr.bf16.mxu1 %v2112_v0 }
 0x165   :  { %1747 = vmatpush3.bf16.msra.mxu0 %v528_v42 }
 0x166   :  { %1758 = vmatprep.subr.bf16.mxu0 %v2112_v0 }
 0x1ca   :  { %v627_v14 = vpop.permute.xlu1 %626 }
 0x1cb   :  { %v632_v27 = vsel %vm360_vm2, %v627_v14, 0 }
 0x231   :  { %v401_v53 = vpop.f32.mrb[4].mxu1 }
 0x232   :  { %v402_v54 = vadd.f32 %v401_v53, %v2382_v51  ;;  %v1732_v55 = vpop.f32.mrb[5].mxu1 }
 0x233   :  { %v404_v56 = vpop.f32.mrb[6].mxu1  ;;  %v447_v57 = vpop.f32.mrb[8].mxu0 }
 0x234   :  { %v448_v58 = vadd.f32 %v447_v57, %v2384_v52  ;;  %v1733_v59 = vpop.f32.mrb[7].mxu1  ;;  %v1738_v60 = vpop.f32.mrb[9].mxu0  ;;  %v453_v61 = vsel %vm360_vm2, %v402_v54, -inf }
 0x235   :  { %454 = vmax.xlane.f32.xlu0 %v453_v61  ;;  %v450_v62 = vpop.f32.mrb[10].mxu0 }
 0x236   :  { %v1739_v63 = vpop.f32.mrb[11].mxu0  ;;  %v456_v1 = vsel %vm360_vm2, %v448_v58, -inf }
 0x239   :  { %457 = vmax.xlane.f32.xlu0 %v456_v1 }
 0x24f   :  { %574 = vrot.lane.b32.xlu0 %v2342_v19, %s2114_s4 }
 0x2c2   :  { %v455_v2 = vpop.xlane.xlu0 %454 }
 0x2c3   :  { %v459_v3 = vsub.f32 %v402_v54, %v455_v2 }
 0x2c5   :  { %v461_v4 = vmul.f32 1.442695, %v459_v3 }
 0x2c6   :  { %v458_v7 = vpop.xlane.xlu0 %457 }
 0x2c7   :  { %1900 = vpow2.f32 %v461_v4  ;;  %v460_v8 = vsub.f32 %v448_v58, %v458_v7 }
 0x2c9   :  { %v463_v9 = vmul.f32 1.442695, %v460_v8 }
 0x2ca   :  { %v575_v20 = vpop.permute.xlu0 %574 }
 0x2cb   :  { %1902 = vpow2.f32 %v463_v9  ;;  %v580_v23 = vsel %vm360_vm2, %v575_v20, 0 }
 0x2d1   :  { %v1901_v10 = vpop.eup %1900 }
 0x2d2   :  { %v465_v11 = vsel %vm360_vm2, %v1901_v10, 0.0 }
 0x2d3   :  { %466 = vadd.xlane.f32.xlu1 %v465_v11 }
 0x2d5   :  { %v1903_v12 = vpop.eup %1902 }
 0x2d6   :  { %v468_v13 = vsel %vm360_vm2, %v1903_v12, 0.0 }
 0x2d7   :  { %469 = vadd.xlane.f32.xlu1 %v468_v13 }
 0x2e8   :  { %571 = vrot.lane.b32.xlu1 %v2353_v29, %s2114_s4 }
 0x2ec   :  { %623 = vrot.lane.b32.xlu1 %v2356_v35, %s2114_s4 }
 0x360   :  { %v467_v15 = vpop.xlane.xlu1 %466 }
 0x361   :  { %1904 = vrcp.f32 %v467_v15 }
 0x364   :  { %v470_v16 = vpop.xlane.xlu1 %469 }
 0x365   :  { %1906 = vrcp.f32 %v470_v16 }
 0x368   :  { %v572_v28 = vpop.permute.xlu1 %571 }
 0x36b   :  { %v1905_v17 = vpop.eup %1904 }
 0x36c   :  { %v473_v18 = vmul.f32 %v1905_v17, %v1901_v10  ;;  %v624_v30 = vpop.permute.xlu1 %623 }
 0x36e   :  { %v475_v21 = vpack.c.bf16 %v473_v18, %v473_v18 }
 0x36f   :  { %v1907_v22 = vpop.eup %1906 }
 0x370   :  { %v474_v25 = vmul.f32 %v1907_v22, %v1903_v12  ;;  %1743 = vmatmul.mubr.msk.bf16.vlgmr.msra.gmra.mrb[8].mxu1 %vm360_vm2, %v475_v21 }
 0x371   :  { %1753 = vmatpush3.bf16.xpose.msra.mxu1 %v580_v23  ;;  %1754 = vmatprep.mubr.msk.bf16.mxu1 %vm2113_vm0, %v2112_v0 }
 0x372   :  { %v476_v26 = vpack.c.bf16 %v474_v25, %v474_v25  ;;  %1764 = vmatprep.subr.bf16.mxu1 %v2112_v0 }
 0x374   :  { %1749 = vmatmul.mubr.msk.bf16.vlgmr.msra.gmra.mrb[12].mxu0 %vm360_vm2, %v476_v26 }
 0x375   :  { %1759 = vmatpush3.bf16.xpose.msra.mxu0 %v632_v27  ;;  %1760 = vmatprep.mubr.msk.bf16.mxu0 %vm2113_vm0, %v2112_v0 }
 0x376   :  { %1770 = vmatprep.subr.bf16.mxu0 %v2112_v0 }
 0x378   :  { %1755 = vmatmul.mubr.msk.bf16.vlgmr.msra.gmra.mrb[12].mxu1 %vm360_vm2, %v572_v28 }
 0x379   :  { %1766 = vmatprep.mubr.msk.bf16.mxu1 %vm2113_vm0, %v2112_v0 }
 0x37c   :  { %1761 = vmatmul.mubr.msk.bf16.vlgmr.msra.gmra.mrb[16].mxu0 %vm360_vm2, %v624_v30 }
 0x37d   :  { %1772 = vmatprep.mubr.msk.bf16.mxu0 %vm2113_vm0, %v2112_v0 }
 0x443   :  { %v2414_v31 = vpop.f32.mrb[8].mxu1 }
 0x444   :  { %v1744_v32 = vpop.f32.mrb[9].mxu1 }
 0x445   :  { %v521_v33 = vpop.f32.mrb[10].mxu1 }
 0x446   :  { %v1745_v34 = vpop.f32.mrb[11].mxu1 }
 0x447   :  { %v2416_v36 = vpop.f32.mrb[12].mxu0 }
 0x448   :  { %v1750_v37 = vpop.f32.mrb[13].mxu0 }
 0x449   :  { %v567_v38 = vpop.f32.mrb[14].mxu0 }
 0x44a   :  { %v1751_v41 = vpop.f32.mrb[15].mxu0 }
 0x44b   :  { %v616_v42 = vpop.f32.mrb[12].mxu1 }
 0x44c   :  { %v617_v43 = vadd.f32 %v616_v42, %v2382_v51  ;;  %v1756_v44 = vpop.f32.mrb[13].mxu1 }
 0x44d   :  { %v619_v45 = vpop.f32.mrb[14].mxu1 }
 0x44e   :  { %v1757_v46 = vpop.f32.mrb[15].mxu1  ;;  %v674_v47 = vsel %vm360_vm2, %v617_v43, -inf }
 0x44f   :  { %675 = vmax.xlane.f32.xlu0 %v674_v47  ;;  %v668_v48 = vpop.f32.mrb[16].mxu0 }
 0x450   :  { %v669_v49 = vadd.f32 %v668_v48, %v2384_v52  ;;  %v1762_v50 = vpop.f32.mrb[17].mxu0 }
 0x451   :  { %v671_v53 = vpop.f32.mrb[18].mxu0 }
 0x452   :  { %v1763_v54 = vpop.f32.mrb[19].mxu0  ;;  %v677_v55 = vsel %vm360_vm2, %v669_v49, -inf }
 0x453   :  { %678 = vmax.xlane.f32.xlu1 %v677_v55 }
 0x464   :  { %748 = vrot.lane.b32.xlu1 %v2368_v40, %s2114_s4 }
 0x468   :  { %798 = vrot.lane.b32.xlu1 %v2342_v19, %s2116_s8 }
 0x46c   :  { %848 = vrot.lane.b32.xlu1 %v2344_v24, %s2116_s8 }
 0x470   :  { %846 = vrot.lane.b32.xlu1 %v2356_v35, %s2116_s8 }
 0x4dc   :  { %v676_v56 = vpop.xlane.xlu0 %675 }
 0x4dd   :  { %v680_v57 = vsub.f32 %v617_v43, %v676_v56 }
 0x4df   :  { %v682_v58 = vmul.f32 1.442695, %v680_v57 }
 0x4e0   :  { %v679_v59 = vpop.xlane.xlu1 %678 }
 0x4e1   :  { %1908 = vpow2.f32 %v682_v58  ;;  %v681_v60 = vsub.f32 %v669_v49, %v679_v59 }
 0x4e3   :  { %v684_v61 = vmul.f32 1.442695, %v681_v60 }
 0x4e4   :  { %v749_v62 = vpop.permute.xlu1 %748 }
 0x4e5   :  { %1910 = vpow2.f32 %v684_v61  ;;  %v754_v63 = vsel %vm480_vm3, %v749_v62, 0 }
 0x4e6   :  { %1771 = vmatpush3.bf16.msra.mxu0 %v754_v63 }
 0x4e7   :  { %1782 = vmatprep.subr.bf16.mxu0 %v2112_v0 }
 0x4e8   :  { %v799_v12 = vpop.permute.xlu1 %798 }
 0x4e9   :  { %v804_v18 = vsel %vm360_vm2, %v799_v12, 0 }
 0x4eb   :  { %v1909_v1 = vpop.eup %1908 }
 0x4ec   :  { %v686_v2 = vsel %vm360_vm2, %v1909_v1, 0.0  ;;  %v849_v17 = vpop.permute.xlu1 %848 }
 0x4ed   :  { %687 = vadd.xlane.f32.xlu0 %v686_v2  ;;  %v854_v21 = vsel %vm360_vm2, %v849_v17, 0 }
 0x4ef   :  { %v1911_v3 = vpop.eup %1910 }
 0x4f0   :  { %v689_v4 = vsel %vm360_vm2, %v1911_v3, 0.0  ;;  %v847_v23 = vpop.permute.xlu1 %846 }
 0x4f1   :  { %690 = vadd.xlane.f32.xlu0 %v689_v4 }
 0x507   :  { %699 = vrot.lane.b32.xlu0 %v2366_v39, %s2114_s4 }
 0x50b   :  { %796 = vrot.lane.b32.xlu0 %v2353_v29, %s2116_s8 }
 0x57a   :  { %v688_v7 = vpop.xlane.xlu0 %687 }
 0x57b   :  { %1912 = vrcp.f32 %v688_v7 }
 0x57e   :  { %v691_v8 = vpop.xlane.xlu0 %690 }
 0x57f   :  { %1914 = vrcp.f32 %v691_v8 }
 0x582   :  { %v700_v9 = vpop.permute.xlu0 %699 }
 0x583   :  { %v705_v10 = vsel %vm480_vm3, %v700_v9, 0 }
 0x584   :  { %1765 = vmatpush3.bf16.msra.mxu1 %v705_v10 }
 0x585   :  { %v1913_v11 = vpop.eup %1912  ;;  %1776 = vmatprep.subr.bf16.mxu1 %v2112_v0 }
 0x586   :  { %v694_v13 = vmul.f32 %v1913_v11, %v1909_v1  ;;  %v797_v22 = vpop.permute.xlu0 %796 }
 0x588   :  { %v696_v14 = vpack.c.bf16 %v694_v13, %v694_v13 }
 0x589   :  { %v1915_v15 = vpop.eup %1914 }
 0x58a   :  { %v695_v16 = vmul.f32 %v1915_v15, %v1911_v3  ;;  %1767 = vmatmul.mubr.msk.bf16.vlgmr.msra.gmra.mrb[16].mxu1 %vm360_vm2, %v696_v14 }
 0x58b   :  { %1778 = vmatprep.mubr.msk.bf16.mxu1 %vm2113_vm0, %v2112_v0 }
 0x58c   :  { %v697_v20 = vpack.c.bf16 %v695_v16, %v695_v16 }
 0x58d   :  { %1777 = vmatpush3.bf16.xpose.msra.mxu1 %v804_v18 }
 0x58e   :  { %1773 = vmatmul.mubr.msk.bf16.vlgmr.msra.gmra.mrb[20].mxu0 %vm360_vm2, %v697_v20  ;;  %1788 = vmatprep.subr.bf16.mxu1 %v2112_v0 }
 0x58f   :  { %1783 = vmatpush3.bf16.xpose.msra.mxu0 %v854_v21  ;;  %1784 = vmatprep.mubr.msk.bf16.mxu0 %vm2113_vm0, %v2112_v0 }
 0x590   :  { %1794 = vmatprep.subr.bf16.mxu0 %v2112_v0 }
 0x594   :  { %1779 = vmatmul.mubr.msk.bf16.vlgmr.msra.gmra.mrb[20].mxu1 %vm360_vm2, %v797_v22 }
 0x595   :  { %1790 = vmatprep.mubr.msk.bf16.mxu1 %vm2113_vm0, %v2112_v0 }
 0x596   :  { %1785 = vmatmul.mubr.msk.bf16.vlgmr.msra.gmra.mrb[24].mxu0 %vm360_vm2, %v847_v23 }
 0x597   :  { %1796 = vmatprep.mubr.msk.bf16.mxu0 %vm2113_vm0, %v2112_v0 }
 0x65d   :  { %v2456_v25 = vpop.f32.mrb[16].mxu1 }
 0x65e   :  { %v1768_v26 = vpop.f32.mrb[17].mxu1 }
 0x65f   :  { %v744_v27 = vpop.f32.mrb[18].mxu1 }
 0x660   :  { %v1769_v28 = vpop.f32.mrb[19].mxu1 }
 0x661   :  { %v2458_v30 = vpop.f32.mrb[20].mxu0 }
 0x662   :  { %v1871_v32 = vpack.i.bf16 %v2458_v30, %v2456_v25  ;;  %v1774_v33 = vpop.f32.mrb[21].mxu0 }
 0x663   :  { %v793_v34 = vpop.f32.mrb[22].mxu0 }
 0x664   :  { %v1775_v37 = vpop.f32.mrb[23].mxu0 }
 0x667   :  { %v840_v38 = vpop.f32.mrb[20].mxu1 }
 0x668   :  { %v841_v41 = vadd.f32 %v840_v38, %v2382_v51  ;;  %v1780_v42 = vpop.f32.mrb[21].mxu1 }
 0x669   :  { %v843_v43 = vpop.f32.mrb[22].mxu1  ;;  %v890_v44 = vpop.f32.mrb[24].mxu0 }
 0x66a   :  { %v891_v45 = vadd.f32 %v890_v44, %v2384_v52  ;;  %v1781_v46 = vpop.f32.mrb[23].mxu1  ;;  %v1786_v47 = vpop.f32.mrb[25].mxu0  ;;  %v896_v48 = vsel %vm360_vm2, %v841_v41, -inf }
 0x66b   :  { %897 = vmax.xlane.f32.xlu0 %v896_v48  ;;  %v893_v49 = vpop.f32.mrb[26].mxu0 }
 0x66c   :  { %v1787_v50 = vpop.f32.mrb[27].mxu0  ;;  %v899_v53 = vsel %vm360_vm2, %v891_v45, -inf }
 0x66d   :  { %900 = vmax.xlane.f32.xlu1 %v899_v53 }
 0x67e   :  { %968 = vrot.lane.b32.xlu1 %v2368_v40, %s2116_s8 }
 0x682   :  { %1018 = vrot.lane.b32.xlu1 %v2342_v19, %s2117_s3 }
 0x686   :  { %1068 = vrot.lane.b32.xlu1 %v2344_v24, %s2117_s3 }
 0x68a   :  { %1066 = vrot.lane.b32.xlu1 %v2356_v35, %s2117_s3 }
 0x6f8   :  { %v898_v54 = vpop.xlane.xlu0 %897 }
 0x6f9   :  { %v902_v55 = vsub.f32 %v841_v41, %v898_v54 }
 0x6fa   :  { %v901_v56 = vpop.xlane.xlu1 %900 }
 0x6fb   :  { %v904_v57 = vmul.f32 1.442695, %v902_v55  ;;  %v903_v58 = vsub.f32 %v891_v45, %v901_v56 }
 0x6fd   :  { %1916 = vpow2.f32 %v904_v57  ;;  %v906_v59 = vmul.f32 1.442695, %v903_v58 }
 0x6fe   :  { %v969_v60 = vpop.permute.xlu1 %968 }
 0x6ff   :  { %1918 = vpow2.f32 %v906_v59  ;;  %v974_v61 = vsel %vm480_vm3, %v969_v60, 0 }
 0x700   :  { %1795 = vmatpush3.bf16.msra.mxu0 %v974_v61 }
 0x701   :  { %1806 = vmatprep.subr.bf16.mxu0 %v2112_v0 }
 0x702   :  { %v1019_v7 = vpop.permute.xlu1 %1018 }
 0x706   :  { %v1069_v12 = vpop.permute.xlu1 %1068 }
 0x707   :  { %v1917_v19 = vpop.eup %1916  ;;  %v1074_v14 = vsel %vm360_vm2, %v1069_v12, 0 }
 0x708   :  { %v908_v24 = vsel %vm360_vm2, %v1917_v19, 0.0 }
 0x709   :  { %v1919_v62 = vpop.eup %1918  ;;  %909 = vadd.xlane.f32.xlu0 %v908_v24 }
 0x70a   :  { %v911_v35 = vsel %vm360_vm2, %v1919_v62, 0.0  ;;  %v1067_v16 = vpop.permute.xlu1 %1066 }
 0x70d   :  { %912 = vadd.xlane.f32.xlu0 %v911_v35 }
 0x723   :  { %920 = vrot.lane.b32.xlu0 %v2366_v39, %s2116_s8 }
 0x727   :  { %1016 = vrot.lane.b32.xlu0 %v2353_v29, %s2117_s3  ;;  %v1024_v29 = vsel %vm360_vm2, %v1019_v7, 0 }
 0x796   :  { %v910_v63 = vpop.xlane.xlu0 %909 }
 0x797   :  { %1920 = vrcp.f32 %v910_v63  ;;  %v1892_v63 = vld [vmem:[#allocation10] sm:$0xff]  }
 0x79a   :  { %v913_v1 = vpop.xlane.xlu0 %912 }
 0x79b   :  { %1922 = vrcp.f32 %v913_v1  ;;  %v1893_v1 = vld [vmem:[#allocation10 + $0x8] sm:$0xff]  }
 0x79e   :  { %v921_v2 = vpop.permute.xlu0 %920 }
 0x79f   :  { %v926_v3 = vsel %vm480_vm3, %v921_v2, 0 }
 0x7a0   :  { %1789 = vmatpush3.bf16.msra.mxu1 %v926_v3 }
 0x7a1   :  { %v1921_v4 = vpop.eup %1920  ;;  %1800 = vmatprep.subr.bf16.mxu1 %v2112_v0 }
 0x7a2   :  { %v916_v8 = vmul.f32 %v1921_v4, %v1917_v19  ;;  %v1017_v15 = vpop.permute.xlu0 %1016 }
 0x7a4   :  { %v918_v9 = vpack.c.bf16 %v916_v8, %v916_v8 }
 0x7a5   :  { %v1923_v10 = vpop.eup %1922 }
 0x7a6   :  { %v917_v11 = vmul.f32 %v1923_v10, %v1919_v62  ;;  %1791 = vmatmul.mubr.msk.bf16.vlgmr.msra.gmra.mrb[24].mxu1 %vm360_vm2, %v918_v9 }
 0x7a7   :  { %1802 = vmatprep.mubr.msk.bf16.mxu1 %vm2113_vm0, %v2112_v0 }
 0x7a8   :  { %v919_v13 = vpack.c.bf16 %v917_v11, %v917_v11 }
 0x7a9   :  { %1801 = vmatpush3.bf16.xpose.msra.mxu1 %v1024_v29 }
 0x7aa   :  { %1797 = vmatmul.mubr.msk.bf16.vlgmr.msra.gmra.mrb[28].mxu0 %vm360_vm2, %v919_v13  ;;  %1812 = vmatprep.subr.bf16.mxu1 %v2112_v0 }
 0x7ab   :  { %1807 = vmatpush3.bf16.xpose.msra.mxu0 %v1074_v14  ;;  %1808 = vmatprep.mubr.msk.bf16.mxu0 %vm2113_vm0, %v2112_v0 }
 0x7ac   :  { %1818 = vmatprep.subr.bf16.mxu0 %v2112_v0 }
 0x7b0   :  { %1803 = vmatmul.mubr.msk.bf16.vlgmr.msra.gmra.mrb[28].mxu1 %vm360_vm2, %v1017_v15 }
 0x7b1   :  { %1814 = vmatprep.mubr.msk.bf16.mxu1 %vm2113_vm0, %v2112_v0 }
 0x7b2   :  { %1809 = vmatmul.mubr.msk.bf16.vlgmr.msra.gmra.mrb[32].mxu0 %vm360_vm2, %v1067_v16 }
 0x7b3   :  { %1820 = vmatprep.mubr.msk.bf16.mxu0 %vm2113_vm0, %v2112_v0 }
 0x879   :  { %v962_v17 = vpop.f32.mrb[24].mxu1 }
 0x87a   :  { %v1792_v18 = vpop.f32.mrb[25].mxu1 }
 0x87b   :  { %v965_v20 = vpop.f32.mrb[26].mxu1 }
 0x87c   :  { %v1793_v21 = vpop.f32.mrb[27].mxu1 }
 0x87d   :  { %v1010_v22 = vpop.f32.mrb[28].mxu0 }
 0x87e   :  { %v1876_v23 = vpack.i.bf16 %v1010_v22, %v962_v17  ;;  %v1798_v26 = vpop.f32.mrb[29].mxu0 }
 0x87f   :  { %v1013_v27 = vpop.f32.mrb[30].mxu0 }
 0x880   :  { %v1799_v28 = vpop.f32.mrb[31].mxu0 }
 0x883   :  { %v1060_v33 = vpop.f32.mrb[28].mxu1 }
 0x884   :  { %v1061_v34 = vadd.f32 %v1060_v33, %v2382_v51  ;;  %v1804_v37 = vpop.f32.mrb[29].mxu1 }
 0x885   :  { %v1063_v38 = vpop.f32.mrb[30].mxu1  ;;  %v1110_v41 = vpop.f32.mrb[32].mxu0  ;;  %v1634_v37 = vld [vmem:[#allocation11] ss:$0 sm:$0xff] }
 0x886   :  { %v1111_v42 = vadd.f32 %v1110_v41, %v2384_v52  ;;  %v1805_v43 = vpop.f32.mrb[31].mxu1  ;;  %v1810_v44 = vpop.f32.mrb[33].mxu0  ;;  %v1116_v45 = vsel %vm360_vm2, %v1061_v34, -inf }
 0x887   :  { %1117 = vmax.xlane.f32.xlu0 %v1116_v45  ;;  %v1113_v46 = vpop.f32.mrb[34].mxu0 }
 0x888   :  { %v1811_v47 = vpop.f32.mrb[35].mxu0  ;;  %v1119_v48 = vsel %vm360_vm2, %v1111_v42, -inf }
 0x889   :  { %1120 = vmax.xlane.f32.xlu1 %v1119_v48 }
 0x89a   :  { %1188 = vrot.lane.b32.xlu1 %v2368_v40, %s2117_s3 }
 0x89e   :  { %1872 = vrot.lane.b32.xlu1 %v1871_v32, %s2118_s9 }
 0x8a2   :  { %1877 = vrot.lane.b32.xlu1 %v1876_v23, %s2119_s24 }
 0x914   :  { %v1118_v51 = vpop.xlane.xlu0 %1117 }
 0x915   :  { %v1122_v52 = vsub.f32 %v1061_v34, %v1118_v51 }
 0x916   :  { %v1121_v49 = vpop.xlane.xlu1 %1120 }
 0x917   :  { %v1124_v50 = vmul.f32 1.442695, %v1122_v52  ;;  %v1123_v53 = vsub.f32 %v1111_v42, %v1121_v49 }
 0x919   :  { %1924 = vpow2.f32 %v1124_v50  ;;  %v1126_v54 = vmul.f32 1.442695, %v1123_v53 }
 0x91a   :  { %v1189_v55 = vpop.permute.xlu1 %1188 }
 0x91b   :  { %1926 = vpow2.f32 %v1126_v54  ;;  %v1194_v56 = vsel %vm480_vm3, %v1189_v55, 0 }
 0x91c   :  { %1819 = vmatpush3.bf16.msra.mxu0 %v1194_v56 }
 0x91d   :  { %1832 = vmatprep.subr.bf16.mxu0 %v2112_v0 }
 0x91e   :  { %v1873_v29 = vpop.permute.xlu1 %1872 }
 0x91f   :  { %v1875_v14 = vunpack.i.h.bf16 %v1873_v29  ;;  %v1874_v15 = vunpack.i.l.bf16 %v1873_v29 }
 0x921   :  { %v1261_v20 = vsel %vm360_vm2, %v2416_v36, %v1875_v14  ;;  %v1260_v21 = vsel %vm360_vm2, %v2414_v31, %v1874_v15 }
 0x922   :  { %v1878_v13 = vpop.permute.xlu1 %1877 }
 0x923   :  { %v1925_v40 = vpop.eup %1924  ;;  %v1880_v16 = vunpack.i.h.bf16 %v1878_v13  ;;  %v1879_v17 = vunpack.i.l.bf16 %v1878_v13 }
 0x924   :  { %v1128_v25 = vsel %vm360_vm2, %v1925_v40, 0.0 }
 0x925   :  { %v1927_v30 = vpop.eup %1926  ;;  %1129 = vadd.xlane.f32.xlu0 %v1128_v25  ;;  %v1263_v26 = vsel %vm1262_vm6, %v1260_v21, %v1879_v17  ;;  %v1264_v27 = vsel %vm1262_vm6, %v1261_v20, %v1880_v16  ;;  %v1896_v25 = vld [vmem:[%s2613_s14] sm:$0xff]  }
 0x926   :  { %v1131_v32 = vsel %vm360_vm2, %v1927_v30, 0.0 }
 0x929   :  { %1132 = vadd.xlane.f32.xlu0 %v1131_v32 }
 0x93f   :  { %1140 = vrot.lane.b32.xlu0 %v2366_v39, %s2117_s3  ;;  %s2121_s3 = smov [#allocation13]  }
 0x940   :  { %s1591_s24 = sshll.u32 %s2121_s3, 4  ;;  %s1592_s24 = int_to_ptr.vmem [resolvable:$true] %s1591_s24 }
 0x941   :  { %p2077_p7 = scmp.lt.s32.totalorder %s1592_s24, %s1592_s24 }
 0x9b2   :  { %v1130_v57 = vpop.xlane.xlu0 %1129 }
 0x9b3   :  { %1928 = vrcp.f32 %v1130_v57 }
 0x9b6   :  { %v1133_v58 = vpop.xlane.xlu0 %1132 }
 0x9b7   :  { %1930 = vrcp.f32 %v1133_v58 }
 0x9ba   :  { %v1141_v59 = vpop.permute.xlu0 %1140 }
 0x9bb   :  { %v1146_v60 = vsel %vm480_vm3, %v1141_v59, 0 }
 0x9bc   :  { %1813 = vmatpush3.bf16.msra.mxu1 %v1146_v60 }
 0x9bd   :  { %v1929_v61 = vpop.eup %1928  ;;  %1824 = vmatprep.subr.bf16.mxu1 %v2112_v0 }
 0x9be   :  { %v1136_v19 = vmul.f32 %v1929_v61, %v1925_v40  ;;  %v1895_v40 = vld [vmem:[%s2611_s12 + $0x8] sm:$0xff]  }
 0x9c0   :  { %v1138_v24 = vpack.c.bf16 %v1136_v19, %v1136_v19 }
 0x9c1   :  { %v1931_v62 = vpop.eup %1930 }
 0x9c2   :  { %v1137_v35 = vmul.f32 %v1931_v62, %v1927_v30  ;;  %1815 = vmatmul.mubr.msk.bf16.vlgmr.msra.gmra.mrb[32].mxu1 %vm360_vm2, %v1138_v24  ;;  %v1897_v30 = vld [vmem:[%s2613_s14 + $0x8] sm:$0xff]   ;;  %v1638_v62 = vld [vmem:[%s2609_s10] ss:$0 sm:$0xff] }
 0x9c3   :  { %1828 = vmatprep.mubr.msk.bf16.mxu1 %vm2113_vm0, %v2112_v0  ;;  %1825 = vmatpush3.bf16.msra.mxu1 %v1892_v63 }
 0x9c4   :  { %v1139_v39 = vpack.c.bf16 %v1137_v35, %v1137_v35  ;;  %1826 = vmatprep.subr.bf16.mxu1 %v2112_v0 }
 0x9c6   :  { %1821 = vmatmul.mubr.msk.bf16.vlgmr.msra.gmra.mrb[36].mxu0 %vm360_vm2, %v1139_v39 }
 0x9c7   :  { %1836 = vmatprep.mubr.msk.bf16.mxu0 %vm2113_vm0, %v2112_v0  ;;  %1827 = vmatpush3.bf16.msra.mxu1 %v1893_v1  ;;  %v1639_v1 = vld [vmem:[%s2610_s11] ss:$0 sm:$0xff] }
 0x9c8   :  { %1840 = vmatprep.subr.bf16.mxu1 %v2112_v0 }
 0xa95   :  { %v1182_v2 = vpop.f32.mrb[32].mxu1 }
 0xa96   :  { %v1816_v3 = vpop.f32.mrb[33].mxu1 }
 0xa97   :  { %v1185_v4 = vpop.f32.mrb[34].mxu1 }
 0xa98   :  { %v1817_v7 = vpop.f32.mrb[35].mxu1 }
 0xa99   :  { %v1230_v8 = vpop.f32.mrb[36].mxu0 }
 0xa9a   :  { %v1881_v9 = vpack.i.bf16 %v1230_v8, %v1182_v2  ;;  %v1822_v10 = vpop.f32.mrb[37].mxu0  ;;  %v1898_v8 = vld [vmem:[%s2613_s14 + $0x10] sm:$0xff]  }
 0xa9b   :  { %v1233_v11 = vpop.f32.mrb[38].mxu0  ;;  %v1640_v10 = vld [vmem:[%s2612_s13] ss:$0 sm:$0xff] }
 0xa9c   :  { %1882 = vrot.lane.b32.xlu0 %v1881_v9, %s2120_s7  ;;  %v1823_v12 = vpop.f32.mrb[39].mxu0  ;;  %v1899_v9 = vld [vmem:[%s2613_s14 + $0x18] sm:$0xff]   ;;  %s2072_s7 = scalar_lea.vmem %s1592_s24, 256 }
 0xa9d   :  { %p2073_p6 = scmp.ne.s32.totalorder %s1592_s24, %s2072_s7  ;;  %p2078_p8 = scmp.lt.s32.totalorder %s2072_s7, %s2072_s7 }
 0xa9f   :  { %p2079_p9 = por %p2078_p8, %p2077_p7 }
 0xaa1   :  { %p2080_p10 = pnand %p2079_p9, %p2073_p6 }
 0xb0e   :  { %v1883_v18 = vpop.permute.xlu0 %1882 }
 0xb0f   :  { %v1885_v22 = vunpack.i.h.bf16 %v1883_v18  ;;  %v1884_v23 = vunpack.i.l.bf16 %v1883_v18 }
 0xb11   :  { %v1267_v28 = vsel %vm1265_vm7, %v1264_v27, %v1885_v22  ;;  %v1266_v33 = vsel %vm1265_vm7, %v1263_v26, %v1884_v23 }
 0xb12   :  { %v1268_v34 = vpack.c.bf16 %v1267_v28, %v1266_v33 }
 0xb14   :  { %1829 = vmatmul.mubr.msk.bf16.vlgmr.msra.gmra.mrb[36].mxu1 %vm161_vm1, %v1268_v34 }
 0xb15   :  { %1848 = vmatprep.mubr.msk.bf16.mxu1 %vm2113_vm0, %v2112_v0  ;;  %1841 = vmatpush3.bf16.msra.mxu1 %v1896_v25 }
 0xb16   :  { %1842 = vmatprep.subr.bf16.mxu1 %v2112_v0 }
 0xb19   :  { %1843 = vmatpush3.bf16.msra.mxu1 %v1897_v30 }
 0xb1a   :  { %1844 = vmatprep.subr.bf16.mxu1 %v2112_v0 }
 0xb1d   :  { %1845 = vmatpush3.bf16.msra.mxu1 %v1898_v8 }
 0xb1e   :  { %1846 = vmatprep.subr.bf16.mxu1 %v2112_v0 }
 0xb21   :  { %1847 = vmatpush3.bf16.msra.mxu1 %v1899_v9 }
 0xbe7   :  { %v1329_v38 = vpop.f32.mrb[36].mxu1 }
 0xbe8   :  { %v1330_v41 = vadd.f32 %v1634_v37, %v1329_v38  ;;  %v1830_v42 = vpop.f32.mrb[37].mxu1 }
 0xbe9   :  { %v1332_v36 = vpop.f32.mrb[38].mxu1 }
 0xbea   :  { %v1333_v43 = vadd.f32 %v1634_v37, %v1332_v36  ;;  %v1831_v44 = vpop.f32.mrb[39].mxu1  ;;  %v1336_v31 = vadd.f32 %v1330_v41, %v2320_v5 }
 0xbec   :  { %v1338_v45 = vsel %vm161_vm1, %v1336_v31, 0.0  ;;  %v1337_v46 = vadd.f32 %v1333_v43, %v2325_v6  ;;  %v1894_v6 = vld [vmem:[%s2611_s12] sm:$0xff]  }
 0xbed   :  { %1339 = vadd.xlane.f32.xlu1 %v1338_v45  ;;  %1833 = vmatpush3.bf16.msra.mxu0 %v1894_v6  ;;  %v1651_v6 = vld [vmem:[%s2616_s17] ss:$0 sm:$0xff] }
 0xbee   :  { %v1341_v47 = vsel %vm161_vm1, %v1337_v46, 0.0  ;;  %1834 = vmatprep.subr.bf16.mxu0 %v2112_v0  ;;  %v1644_v0 = vld [vmem:[%s2614_s15] ss:$0 sm:$0xff] }
 0xbef   :  { %1342 = vadd.xlane.f32.xlu0 %v1341_v47 }
 0xbf1   :  { %1835 = vmatpush3.bf16.msra.mxu0 %v1895_v40 }
 0xc7a   :  { %v1340_v48 = vpop.xlane.xlu1 %1339 }
 0xc7b   :  { %v1345_v51 = vmul.f32 0.03125, %v1340_v48 }
 0xc7c   :  { %v1343_v52 = vpop.xlane.xlu0 %1342 }
 0xc7d   :  { %v1347_v49 = vsub.f32 %v1336_v31, %v1345_v51  ;;  %v1346_v50 = vmul.f32 0.03125, %v1343_v52 }
 0xc7f   :  { %v1348_v53 = vsub.f32 %v1337_v46, %v1346_v50  ;;  %v1349_v54 = vmul.f32 %v1347_v49, %v1347_v49 }
 0xc81   :  { %v1351_v55 = vsel %vm161_vm1, %v1349_v54, 0.0  ;;  %v1350_v56 = vmul.f32 %v1348_v53, %v1348_v53 }
 0xc82   :  { %1352 = vadd.xlane.f32.xlu0 %v1351_v55  ;;  %v1650_v55 = vld [vmem:[%s2615_s16] ss:$0 sm:$0xff] }
 0xc83   :  { %v1354_v5 = vsel %vm161_vm1, %v1350_v56, 0.0 }
 0xc86   :  { %1355 = vadd.xlane.f32.xlu0 %v1354_v5 }
 0xd0f   :  { %v1353_v32 = vpop.xlane.xlu0 %1352 }
 0xd10   :  { %v1357_v57 = vmul.f32 0.03125, %v1353_v32 }
 0xd12   :  { %v1359_v58 = vadd.f32 1e-05, %v1357_v57 }
 0xd13   :  { %v1356_v59 = vpop.xlane.xlu0 %1355 }
 0xd14   :  { %1932 = vrsqrt.f32 %v1359_v58  ;;  %v1358_v60 = vmul.f32 0.03125, %v1356_v59 }
 0xd16   :  { %v1360_v61 = vadd.f32 1e-05, %v1358_v60 }
 0xd18   :  { %1934 = vrsqrt.f32 %v1360_v61 }
 0xd1e   :  { %v1933_v19 = vpop.eup %1932 }
 0xd1f   :  { %v1363_v24 = vmul.f32 %v1933_v19, %v1347_v49 }
 0xd21   :  { %v1372_v39 = vmul.f32 %v1638_v62, %v1363_v24 }
 0xd22   :  { %v1935_v35 = vpop.eup %1934 }
 0xd23   :  { %v1364_v63 = vmul.f32 %v1935_v35, %v1348_v53  ;;  %v1381_v3 = vadd.f32 %v1639_v1, %v1372_v39 }
 0xd25   :  { %v1373_v2 = vmul.f32 %v1638_v62, %v1364_v63 }
 0xd27   :  { %v1382_v4 = vadd.f32 %v1639_v1, %v1373_v2 }
 0xd29   :  { %v1383_v7 = vpack.c.bf16 %v1382_v4, %v1381_v3 }
 0xd2b   :  { %1837 = vmatmul.mubr.msk.bf16.vlgmr.msra.gmra.mrb[40].mxu0 %vm161_vm1, %v1383_v7 }
 0xdfe   :  { %v1444_v11 = vpop.f32.mrb[40].mxu0 }
 0xdff   :  { %v1445_v12 = vadd.f32 %v1640_v10, %v1444_v11  ;;  %v1838_v29 = vpop.f32.mrb[41].mxu0 }
 0xe00   :  { %v1447_v13 = vpop.f32.mrb[42].mxu0 }
 0xe01   :  { %v1448_v14 = vadd.f32 %v1640_v10, %v1447_v13  ;;  %v1839_v15 = vpop.f32.mrb[43].mxu0  ;;  %v1451_v16 = vmax.f32 %v1445_v12, 0.0 }
 0xe03   :  { %v1452_v17 = vmax.f32 %v1448_v14, 0.0 }
 0xe05   :  { %v1453_v18 = vpack.c.bf16 %v1452_v17, %v1451_v16 }
 0xe07   :  { %1849 = vmatmul.mubr.msk.bf16.vlgmr.msra.gmra.mrb[40].mxu1 %vm1493_vm8, %v1453_v18 }
 0xeda   :  { %v1531_v20 = vpop.f32.mrb[40].mxu1 }
 0xedb   :  { %v1532_v21 = vadd.f32 %v1644_v0, %v1531_v20  ;;  %v1850_v22 = vpop.f32.mrb[41].mxu1 }
 0xedc   :  { %v1534_v23 = vpop.f32.mrb[42].mxu1 }
 0xedd   :  { %v1535_v26 = vadd.f32 %v1644_v0, %v1534_v23  ;;  %v1851_v27 = vpop.f32.mrb[43].mxu1  ;;  %v1538_v28 = vadd.f32 %v1532_v21, %v1381_v3 }
 0xedf   :  { %v1540_v33 = vsel %vm161_vm1, %v1538_v28, 0.0  ;;  %v1539_v34 = vadd.f32 %v1535_v26, %v1382_v4 }
 0xee0   :  { %1541 = vadd.xlane.f32.xlu1 %v1540_v33 }
 0xee1   :  { %v1543_v37 = vsel %vm161_vm1, %v1539_v34, 0.0 }
 0xee2   :  { %1544 = vadd.xlane.f32.xlu0 %v1543_v37 }
 0xf6d   :  { %v1542_v38 = vpop.xlane.xlu1 %1541 }
 0xf6e   :  { %v1546_v41 = vmul.f32 0.03125, %v1542_v38 }
 0xf6f   :  { %v1545_v42 = vpop.xlane.xlu0 %1544 }
 0xf70   :  { %v1548_v36 = vsub.f32 %v1538_v28, %v1546_v41  ;;  %v1547_v43 = vmul.f32 0.03125, %v1545_v42 }
 0xf72   :  { %v1549_v44 = vsub.f32 %v1539_v34, %v1547_v43  ;;  %v1550_v31 = vmul.f32 %v1548_v36, %v1548_v36 }
 0xf74   :  { %v1552_v45 = vsel %vm161_vm1, %v1550_v31, 0.0  ;;  %v1551_v46 = vmul.f32 %v1549_v44, %v1549_v44 }
 0xf75   :  { %1553 = vadd.xlane.f32.xlu1 %v1552_v45 }
 0xf76   :  { %v1555_v47 = vsel %vm161_vm1, %v1551_v46, 0.0 }
 0xf77   :  { %1556 = vadd.xlane.f32.xlu0 %v1555_v47 }
0x1002   :  { %v1554_v48 = vpop.xlane.xlu1 %1553 }
0x1003   :  { %v1558_v51 = vmul.f32 0.03125, %v1554_v48 }
0x1004   :  { %v1557_v52 = vpop.xlane.xlu0 %1556 }
0x1005   :  { %v1560_v49 = vadd.f32 1e-05, %v1558_v51  ;;  %v1559_v50 = vmul.f32 0.03125, %v1557_v52 }
0x1007   :  { %1936 = vrsqrt.f32 %v1560_v49  ;;  %v1561_v53 = vadd.f32 1e-05, %v1559_v50 }
0x1009   :  { %1938 = vrsqrt.f32 %v1561_v53 }
0x1011   :  { %v1937_v54 = vpop.eup %1936 }
0x1012   :  { %v1564_v56 = vmul.f32 %v1937_v54, %v1548_v36 }
0x1013   :  { %v1939_v5 = vpop.eup %1938 }
0x1014   :  { %v1573_v40 = vmul.f32 %v1650_v55, %v1564_v56  ;;  %v1565_v25 = vmul.f32 %v1939_v5, %v1549_v44 }
0x1016   :  { %v1574_v30 = vmul.f32 %v1650_v55, %v1565_v25  ;;  %v1582_v32 = vadd.f32 %v1651_v6, %v1573_v40 }
0x1018   :  { %v1583_v57 = vadd.f32 %v1651_v6, %v1574_v30  ;;  %1584 = vst.msk [vmem:[#allocation13] sm:$0xff] %vm161_vm1, %v1582_v32 }
0x101a   :  { %1585 = vst.msk [vmem:[#allocation13 + $0x8] sm:$0xff] %vm161_vm1, %v1583_v57 }
0x101b   :  { %2083 = shalt.err (!%p2080_p10)
}
0x101c   :  { %s2084_s22 = scalar_lea.hbm %s2617_s18, 256 }
0x101d   :  { %p2085_p11 = scmp.ne.s32.totalorder %s2617_s18, %s2084_s22  ;;  %p2088_p12 = scmp.lt.u32.totalorder %s2084_s22, %s2617_s18 }
0x101f   :  { %p2090_p13 = pnand %p2088_p12, %p2085_p11 }
0x1021   :  { %2093 = shalt.err (!%p2090_p13)
}
0x1022   :  { %s2122_s26 = smov 128  }
0x1023   :  { %1597 = dma.vmem_to_hbm [thread:$0]  %s1592_s24, 256, %s2617_s18, [#allocation4], %s2122_s26, %s2122_s26, %s2118_s9  }
0x1024   :  { %2102 = dma.done.wait [#allocation4], 256  }
0x1025   :  { %2103 = vsyncadd [#allocation4], 4294967040 }
0x1026   :  { %1601 = vsyncpa [#allocation3], 1 }
0x1027   :  { %1602 = vsyncpa [#allocation6], 1 }
0x1028   :  { %1603 = vsyncpa [#allocation9], 1 }
0x1029   :  { %1604 = vsyncpa [#allocation12], 1 }
0x102a   :  { %1605 = vsyncpa [#allocation4], 1 }

</bundles_post_ra>
